<compile_context>
chip_gen: v5e
topology: v5e:2x2
jax: 0.10.0
libtpu: 0.0.40
codegen_flags: <defaults>
</compile_context>

<pallas_src>
import functools
import math

import jax
import jax.numpy as jnp
from jax.experimental import pallas as pl
from jax.experimental.pallas import tpu as pltpu


@functools.lru_cache(maxsize=None)
def _vmem_limit_bytes():
    """Generation-aware scoped-VMEM budget (~3/4 of physical, capped)."""
    cap = 64 * 1024 * 1024
    try:
        cap = int(getattr(pltpu.get_tpu_info(), "vmem_capacity_bytes", cap))
    except Exception:
        pass
    # v5e/v6e (128 MiB) -> 96 MiB, v7x (64 MiB) -> 48 MiB, never below 32 MiB.
    return max(32 * 1024 * 1024, min(cap * 3 // 4, 100 * 1024 * 1024))


# ----------------------------- Pallas kernels -----------------------------

def _fused_linear_kernel(*refs, apply_ln, apply_relu, add_residual, eps):
    """[LN(f32)] -> bf16 matmul (f32 acc) -> [ReLU] -> [+ residual(f32)]."""
    idx = 0
    x_ref = refs[idx]; idx += 1
    if apply_ln:
        g_ref = refs[idx]; b_ln_ref = refs[idx + 1]; idx += 2
    w_ref = refs[idx]; b_ref = refs[idx + 1]; idx += 2
    if add_residual:
        r_ref = refs[idx]; idx += 1
    o_ref = refs[idx]

    x = x_ref[...]
    if apply_ln:
        xf = x.astype(jnp.float32)
        mu = jnp.mean(xf, axis=-1, keepdims=True)
        xc = xf - mu
        var = jnp.mean(xc * xc, axis=-1, keepdims=True)
        xf = xc * jax.lax.rsqrt(var + eps)
        xf = xf * g_ref[...].astype(jnp.float32) + b_ln_ref[...].astype(jnp.float32)
        x = xf.astype(w_ref.dtype)          # bf16 operand for the MXU
    else:
        x = x.astype(w_ref.dtype)

    y = jnp.dot(x, w_ref[...], preferred_element_type=jnp.float32)
    y = y + b_ref[...].astype(jnp.float32)
    if apply_relu:
        y = jnp.maximum(y, 0.0)
    if add_residual:
        y = y + r_ref[...].astype(jnp.float32)
    o_ref[...] = y.astype(o_ref.dtype)


def fused_linear(x, w, b, *, gamma=None, beta=None, residual=None,
                 apply_relu=False, eps=1e-5, out_dtype=jnp.bfloat16,
                 block_m=None, block_n=512, alias_residual=False):
    """y = [+res] [relu]( LN?(x) @ w + b ).  x: (M, K), w: (K, N), b: (N,).

    Grid over (rows, output features).  K stays whole in one block because
    the fused LayerNorm prologue needs the entire row.  tn is a multiple of
    128 (or the full N) so output stores stay lane-dense.
    """
    M, K = x.shape
    N = w.shape[1]
    apply_ln = gamma is not None
    add_res = residual is not None

    if block_m is None:
        block_m = 2048 if _vmem_limit_bytes() >= 64 * 1024 * 1024 else 1024
    tm = M if M <= block_m else block_m      # block_m is a multiple of 8
    tn = N if N <= block_n else block_n      # block_n is a multiple of 128
    grid = (pl.cdiv(M, tm), pl.cdiv(N, tn))

    in_specs = [pl.BlockSpec((tm, K), lambda i, j: (i, 0))]
    args = [x]
    if apply_ln:
        in_specs += [pl.BlockSpec((1, K), lambda i, j: (0, 0)),
                     pl.BlockSpec((1, K), lambda i, j: (0, 0))]
        args += [gamma.reshape(1, K), beta.reshape(1, K)]
    in_specs += [pl.BlockSpec((K, tn), lambda i, j: (0, j)),
                 pl.BlockSpec((1, tn), lambda i, j: (0, j))]
    args += [w, b.reshape(1, N)]
    if add_res:
        in_specs += [pl.BlockSpec((tm, tn), lambda i, j: (i, j))]
        args += [residual]

    io_aliases = {}
    if (add_res and alias_residual and residual.dtype == jnp.dtype(out_dtype)
            and residual.shape == (M, N)):
        io_aliases = {len(args) - 1: 0}      # residual buffer -> output buffer

    return pl.pallas_call(
        functools.partial(_fused_linear_kernel, apply_ln=apply_ln,
                          apply_relu=apply_relu, add_residual=add_res, eps=eps),
        out_shape=jax.ShapeDtypeStruct((M, N), out_dtype),
        grid=grid,
        in_specs=in_specs,
        out_specs=pl.BlockSpec((tm, tn), lambda i, j: (i, j)),
        input_output_aliases=io_aliases,
        compiler_params=pltpu.CompilerParams(
            dimension_semantics=("parallel", "parallel"),
            vmem_limit_bytes=_vmem_limit_bytes()),
    )(*args)


def _group_attn_kernel(q_ref, k_ref, v_ref, o_ref, *, scale, inv_groups):
    """Attention over heads-in-group with the dilated-position axis P on lanes.

    Blocks are (1, G, D, P): one batch element per grid step, G = heads in
    this group (tiny), D = head_dim (sublanes), P = n*s_r (lanes).  All math
    is VPU broadcast-multiplies + small-axis XLU reductions -- no MXU.  The
    per-group  x / x.sum(over n, s)  normalization and the final /num_groups
    are fused into the epilogue (exact division).
    """
    q = q_ref[...].astype(jnp.float32)[0]        # (G, D, P)
    k = k_ref[...].astype(jnp.float32)[0]
    v = v_ref[...].astype(jnp.float32)[0]
    G = q.shape[0]

    rows = []
    for g in range(G):
        qg = q[g]                                            # (D, P)
        # scores over heads in group: s[h] = scale * sum_d q[g,d,:]*k[h,d,:]
        s = [jnp.sum(qg * k[h], axis=0, keepdims=True) * scale
             for h in range(G)]                               # (1, P) each
        m = s[0]
        for h in range(1, G):
            m = jnp.maximum(m, s[h])
        e = [jnp.exp(s[h] - m) for h in range(G)]
        z = e[0]
        for h in range(1, G):
            z = z + e[h]
        inv_z = 1.0 / z                                       # exact division
        # weighted value sum: o[g] = sum_h softmax_h * v[h]   -> (D, P)
        o = (e[0] * inv_z) * v[0]
        for h in range(1, G):
            o = o + (e[h] * inv_z) * v[h]
        # fused: x / x.sum(dim=(n, s)) per (g, d), and / num_groups
        denom = jnp.sum(o, axis=-1, keepdims=True)            # (D, 1)
        rows.append(o * (inv_groups / denom))
    o_ref[0] = jnp.stack(rows, axis=0).astype(o_ref.dtype)


def pallas_group_attention(q, k, v, scale, inv_groups):
    """q, k, v: (B, G, D, P) bf16 -> normalized attention output (B, G, D, P)."""
    B, G, D, P = q.shape
    spec = pl.BlockSpec((1, G, D, P), lambda i: (i, 0, 0, 0))
    return pl.pallas_call(
        functools.partial(_group_attn_kernel, scale=scale, inv_groups=inv_groups),
        out_shape=jax.ShapeDtypeStruct((B, G, D, P), jnp.bfloat16),
        grid=(B,),
        in_specs=[spec, spec, spec],
        out_specs=spec,
        compiler_params=pltpu.CompilerParams(
            dimension_semantics=("parallel",),
            vmem_limit_bytes=_vmem_limit_bytes()),
    )(q, k, v)


# ----------------------------- JAX glue (matches PyTorch forward) ----------

def dilated_attention(q, k, v, segment_lengths, dilation_rates):
    """Faithful port of DilatedAttention.forward. q: (b, n, h, d), k/v likewise."""
    b, seq_q, h, d = q.shape
    seq_kv = k.shape[1]
    num_groups = len(dilation_rates)
    group_sizes = [h // num_groups] * num_groups
    for i in range(h % num_groups):
        group_sizes[i] += 1
    ranges = [(i * g, (i + 1) * g) for i, g in enumerate(group_sizes)]
    # Disjoint head ranges -> pure .set scatter (no read-modify-write HBM pass).
    disjoint = True
    for a_i in range(num_groups):
        for b_i in range(a_i + 1, num_groups):
            if max(ranges[a_i][0], ranges[b_i][0]) < min(ranges[a_i][1], ranges[b_i][1]):
                disjoint = False
    # zeros init still needed: positions skipped by the dilation stride (and
    # any uncovered heads) must stay exactly 0, as in the reference.
    out = jnp.zeros((b, seq_q, h, d), jnp.bfloat16)
    scale = 1.0 / math.sqrt(d)
    inv_groups = 1.0 / num_groups

    for i, (g, r, s) in enumerate(zip(group_sizes, dilation_rates, segment_lengths)):
        n_q = seq_q // s
        n_kv = seq_kv // s
        # The PyTorch reference broadcasts (b*n_q) against (b*n_kv); it only
        # works when both are equal -> keep the same constraint explicit.
        assert n_kv == n_q, "dilated cross-attention requires len(memory) == len(tgt)"
        offset = i % r
        hmin, hmax = ranges[i]
        qs = q.reshape(b, n_q, s, h, d)[:, :, offset::r, hmin:hmax, :]
        ks = k.reshape(b, n_kv, s, h, d)[:, :, offset::r, hmin:hmax, :]
        vs = v.reshape(b, n_kv, s, h, d)[:, :, offset::r, hmin:hmax, :]
        sr = qs.shape[2]
        P = n_q * sr

        # lane-dense kernel layout: (b, g, d, P) with P on TPU lanes
        def to_gdp(t):
            return jnp.transpose(t, (0, 3, 4, 1, 2)).reshape(b, g, d, P)

        x = pallas_group_attention(to_gdp(qs), to_gdp(ks), to_gdp(vs),
                                   scale, inv_groups)          # (b, g, d, P)
        x = jnp.transpose(x.reshape(b, g, d, n_q, sr), (0, 3, 4, 1, 2))

        out5 = out.reshape(b, n_q, s, h, d)
        if disjoint:
            out5 = out5.at[:, :, offset::r, hmin:hmax, :].set(x)
        else:
            out5 = out5.at[:, :, offset::r, hmin:hmax, :].add(x)
        out = out5.reshape(b, seq_q, h, d)
    # /num_groups is already folded into the kernel epilogue.
    return out


def dilated_transformer_decoder_layer(params, tgt, memory, num_heads,
                                      segment_lengths, dilation_rates, eps=1e-5):
    b, n, dm = tgt.shape
    nm = memory.shape[1]
    hd = dm // num_heads
    x_flat = tgt.reshape(b * n, dm).astype(jnp.float32)   # residual stream (f32)

    # --- self-attention block: norm1 (fused) -> fused QKV -> dilated attn
    #     -> out_proj (+ residual fused).  self_attn has no inner LayerNorm.
    sa = params["self_attn"]
    qkv = fused_linear(x_flat, sa["wqkv"], sa["bqkv"],
                       gamma=params["norm1_g"], beta=params["norm1_b"], eps=eps,
                       out_dtype=jnp.bfloat16)
    q, k, v = jnp.split(qkv, 3, axis=1)
    q = q.reshape(b, n, num_heads, hd)
    k = k.reshape(b, n, num_heads, hd)
    v = v.reshape(b, n, num_heads, hd)
    a = dilated_attention(q, k, v, segment_lengths, dilation_rates)
    x_flat = fused_linear(a.reshape(b * n, dm), sa["wo"], sa["bo"],
                          residual=x_flat, out_dtype=jnp.float32,
                          alias_residual=True)             # dropout p = 0.0

    # --- cross-attention block: norm2 (fused into Q proj) -> fused KV from
    #     memory -> dilated attn -> inner LN (fused) -> out_proj (+ residual).
    ca = params["cross_attn"]
    mem_flat = memory.reshape(b * nm, dm)
    qc = fused_linear(x_flat, ca["wq"], ca["bq"],
                      gamma=params["norm2_g"], beta=params["norm2_b"], eps=eps,
                      out_dtype=jnp.bfloat16)
    kv = fused_linear(mem_flat, ca["wkv"], ca["bkv"], out_dtype=jnp.bfloat16)
    kc, vc = jnp.split(kv, 2, axis=1)
    qc = qc.reshape(b, n, num_heads, hd)
    kc = kc.reshape(b, nm, num_heads, hd)
    vc = vc.reshape(b, nm, num_heads, hd)
    a = dilated_attention(qc, kc, vc, segment_lengths, dilation_rates)
    x_flat = fused_linear(a.reshape(b * n, dm), ca["wo"], ca["bo"],
                          gamma=ca["ln_g"], beta=ca["ln_b"],
                          residual=x_flat, eps=eps, out_dtype=jnp.float32,
                          alias_residual=True)             # dropout p = 0.0

    # --- feed-forward: norm3 (fused) -> linear1+ReLU -> norm4 (fused)
    #     -> linear2 (+ residual fused).
    hidden = fused_linear(x_flat, params["w1"], params["b1"],
                          gamma=params["norm3_g"], beta=params["norm3_b"],
                          apply_relu=True, eps=eps, out_dtype=jnp.bfloat16)
    x_flat = fused_linear(hidden, params["w2"], params["b2"],
                          gamma=params["norm4_g"], beta=params["norm4_b"],
                          residual=x_flat, eps=eps, out_dtype=jnp.float32,
                          alias_residual=True)             # dropout p = 0.0

    return x_flat.reshape(b, n, dm)


# ----------------------------- parameter init ------------------------------

def xavier_normal(key, fan_in, fan_out, gain=1.0):
    std = gain * math.sqrt(2.0 / (fan_in + fan_out))
    return std * jax.random.normal(key, (fan_in, fan_out), dtype=jnp.float32)


def make_attn_params(key, d_model, with_ln):
    ks = jax.random.split(key, 4)
    wq = xavier_normal(ks[0], d_model, d_model)
    wk = xavier_normal(ks[1], d_model, d_model)
    wv = xavier_normal(ks[2], d_model, d_model)
    wo = xavier_normal(ks[3], d_model, d_model)
    zeros = jnp.zeros((d_model,), jnp.float32)
    p = {
        # concatenated projection weights built once (no per-forward concat)
        "wqkv": jnp.concatenate([wq, wk, wv], axis=1).astype(jnp.bfloat16),
        "bqkv": jnp.zeros((3 * d_model,), jnp.float32),
        "wkv": jnp.concatenate([wk, wv], axis=1).astype(jnp.bfloat16),
        "bkv": jnp.zeros((2 * d_model,), jnp.float32),
        "wq": wq.astype(jnp.bfloat16), "bq": zeros,
        "wo": wo.astype(jnp.bfloat16), "bo": zeros,
    }
    if with_ln:
        p["ln_g"] = jnp.ones((d_model,), jnp.float32)
        p["ln_b"] = jnp.zeros((d_model,), jnp.float32)
    return p


# ----------------------------- main -----------------------------------------

if __name__ == "__main__":
    d_model, nhead, d_ff = 32, 4, 64          # head_dim = 8 (div by 8, <=128)
    segment_lengths = (4, 8)
    dilation_rates = (1, 2)
    b, seq = 2, 16                            # seq divisible by all segments

    root = jax.random.PRNGKey(0)
    k_self, k_cross, k1, k2, k_tgt, k_mem = jax.random.split(root, 6)

    params = {
        "self_attn": make_attn_params(k_self, d_model, with_ln=False),
        "cross_attn": make_attn_params(k_cross, d_model, with_ln=True),
        "norm1_g": jnp.ones((d_model,), jnp.float32),
        "norm1_b": jnp.zeros((d_model,), jnp.float32),
        "norm2_g": jnp.ones((d_model,), jnp.float32),
        "norm2_b": jnp.zeros((d_model,), jnp.float32),
        "norm3_g": jnp.ones((d_model,), jnp.float32),
        "norm3_b": jnp.zeros((d_model,), jnp.float32),
        "norm4_g": jnp.ones((d_ff,), jnp.float32),
        "norm4_b": jnp.zeros((d_ff,), jnp.float32),
        "w1": xavier_normal(k1, d_model, d_ff).astype(jnp.bfloat16),
        "b1": jnp.zeros((d_ff,), jnp.float32),
        "w2": xavier_normal(k2, d_ff, d_model).astype(jnp.bfloat16),
        "b2": jnp.zeros((d_model,), jnp.float32),
    }

    tgt = jax.random.normal(k_tgt, (b, seq, d_model), dtype=jnp.float32)
    memory = jax.random.normal(k_mem, (b, seq, d_model), dtype=jnp.float32)

    fwd = jax.jit(functools.partial(
        dilated_transformer_decoder_layer,
        num_heads=nhead,
        segment_lengths=segment_lengths,
        dilation_rates=dilation_rates))

    out = fwd(params, tgt, memory)
    out = jax.block_until_ready(out)
    assert out.shape == (b, seq, d_model)
    assert bool(jnp.all(jnp.isfinite(out)))
    print("KERNEL_OK")
</pallas_src>

<mosaic_0001>
module attributes {stable_mosaic.version = 11 : i64} {
  func.func @_fused_linear_kernel(%arg0: i32, %arg1: i32, %arg2: memref<32x32xf32, #tpu.memory_space<vmem>>, %arg3: memref<1x32xf32, #tpu.memory_space<vmem>>, %arg4: memref<1x32xf32, #tpu.memory_space<vmem>>, %arg5: memref<32x96xbf16, #tpu.memory_space<vmem>>, %arg6: memref<1x96xf32, #tpu.memory_space<vmem>>, %arg7: memref<32x96xbf16, #tpu.memory_space<vmem>>) attributes {dimension_semantics = [#tpu.dimension_semantics<parallel>, #tpu.dimension_semantics<parallel>], iteration_bounds = array<i64: 1, 1>, scalar_prefetch = 0 : i64, scratch_operands = 0 : i64, tpu.core_type = #tpu.core_type<tc>, window_params = [{transform_indices = @transform_0, window_bounds = array<i64: 32, 32>}, {pipeline_mode = #tpu.pipeline_mode<synchronous>, transform_indices = @transform_1, window_bounds = array<i64: 1, 32>}, {pipeline_mode = #tpu.pipeline_mode<synchronous>, transform_indices = @transform_2, window_bounds = array<i64: 1, 32>}, {transform_indices = @transform_3, window_bounds = array<i64: 32, 96>}, {transform_indices = @transform_4, window_bounds = array<i64: 1, 96>}, {transform_indices = @transform_5, window_bounds = array<i64: 32, 96>}]} {
    %c0 = arith.constant 0 : index
    %c0_0 = arith.constant 0 : index
    %0 = vector.load %arg2[%c0, %c0_0] : memref<32x32xf32, #tpu.memory_space<vmem>>, vector<32x32xf32>
    %cst = arith.constant dense<0.000000e+00> : vector<32xf32>
    %1 = vector.multi_reduction <add>, %0, %cst [1] : vector<32x32xf32> to vector<32xf32>
    %2 = vector.shape_cast %1 : vector<32xf32> to vector<32x1xf32>
    %cst_1 = arith.constant 3.200000e+01 : f32
    %3 = vector.broadcast %cst_1 : f32 to vector<32x1xf32>
    %4 = arith.divf %2, %3 : vector<32x1xf32>
    %5 = vector.broadcast %4 : vector<32x1xf32> to vector<32x32xf32>
    %6 = arith.subf %0, %5 : vector<32x32xf32>
    %7 = arith.mulf %6, %6 : vector<32x32xf32>
    %cst_2 = arith.constant dense<0.000000e+00> : vector<32xf32>
    %8 = vector.multi_reduction <add>, %7, %cst_2 [1] : vector<32x32xf32> to vector<32xf32>
    %9 = vector.shape_cast %8 : vector<32xf32> to vector<32x1xf32>
    %cst_3 = arith.constant 3.200000e+01 : f32
    %10 = vector.broadcast %cst_3 : f32 to vector<32x1xf32>
    %11 = arith.divf %9, %10 : vector<32x1xf32>
    %cst_4 = arith.constant 9.99999974E-6 : f32
    %12 = vector.broadcast %cst_4 : f32 to vector<32x1xf32>
    %13 = arith.addf %11, %12 : vector<32x1xf32>
    %14 = math.rsqrt %13 : vector<32x1xf32>
    %15 = vector.broadcast %14 : vector<32x1xf32> to vector<32x32xf32>
    %16 = arith.mulf %6, %15 : vector<32x32xf32>
    %c0_5 = arith.constant 0 : index
    %c0_6 = arith.constant 0 : index
    %17 = vector.load %arg3[%c0_5, %c0_6] : memref<1x32xf32, #tpu.memory_space<vmem>>, vector<1x32xf32>
    %18 = vector.broadcast %17 : vector<1x32xf32> to vector<32x32xf32>
    %19 = arith.mulf %16, %18 : vector<32x32xf32>
    %c0_7 = arith.constant 0 : index
    %c0_8 = arith.constant 0 : index
    %20 = vector.load %arg4[%c0_7, %c0_8] : memref<1x32xf32, #tpu.memory_space<vmem>>, vector<1x32xf32>
    %21 = vector.broadcast %20 : vector<1x32xf32> to vector<32x32xf32>
    %22 = arith.addf %19, %21 : vector<32x32xf32>
    %23 = arith.truncf %22 : vector<32x32xf32> to vector<32x32xbf16>
    %c0_9 = arith.constant 0 : index
    %c0_10 = arith.constant 0 : index
    %24 = vector.load %arg5[%c0_9, %c0_10] : memref<32x96xbf16, #tpu.memory_space<vmem>>, vector<32x96xbf16>
    %cst_11 = arith.constant dense<0.000000e+00> : vector<32x96xf32>
    %25 = tpu.matmul %23, %24, %cst_11 {dimension_numbers = #tpu.dot_dimension_numbers<[1], [0], [0], [1], [0, 0, 1, 1], [], []>} : vector<32x32xbf16>, vector<32x96xbf16>, vector<32x96xf32> -> vector<32x96xf32>
    %c0_12 = arith.constant 0 : index
    %c0_13 = arith.constant 0 : index
    %26 = vector.load %arg6[%c0_12, %c0_13] : memref<1x96xf32, #tpu.memory_space<vmem>>, vector<1x96xf32>
    %27 = vector.broadcast %26 : vector<1x96xf32> to vector<32x96xf32>
    %28 = arith.addf %25, %27 : vector<32x96xf32>
    %29 = arith.truncf %28 : vector<32x96xf32> to vector<32x96xbf16>
    %c0_14 = arith.constant 0 : index
    %c0_15 = arith.constant 0 : index
    %30 = vector.load %arg7[%c0_14, %c0_15] : memref<32x96xbf16, #tpu.memory_space<vmem>>, vector<32x96xbf16>
    tpu.vector_store %arg7[%c0_14, %c0_15], %29 {strides = array<i32>} : memref<32x96xbf16, #tpu.memory_space<vmem>>, vector<32x96xbf16>,
    return
  }
  func.func @transform_0(%arg0: i32, %arg1: i32) -> (i32, i32) {
    %c0_i32 = arith.constant 0 : i32
    %c0_i32_0 = arith.constant 0 : i32
    return %arg0, %c0_i32 : i32, i32
  }
  func.func @transform_1(%arg0: i32, %arg1: i32) -> (i32, i32) {
    %c0_i32 = arith.constant 0 : i32
    %c0_i32_0 = arith.constant 0 : i32
    %c0_i32_1 = arith.constant 0 : i32
    return %c0_i32, %c0_i32_0 : i32, i32
  }
  func.func @transform_2(%arg0: i32, %arg1: i32) -> (i32, i32) {
    %c0_i32 = arith.constant 0 : i32
    %c0_i32_0 = arith.constant 0 : i32
    %c0_i32_1 = arith.constant 0 : i32
    return %c0_i32, %c0_i32_0 : i32, i32
  }
  func.func @transform_3(%arg0: i32, %arg1: i32) -> (i32, i32) {
    %c0_i32 = arith.constant 0 : i32
    %c0_i32_0 = arith.constant 0 : i32
    return %c0_i32, %arg1 : i32, i32
  }
  func.func @transform_4(%arg0: i32, %arg1: i32) -> (i32, i32) {
    %c0_i32 = arith.constant 0 : i32
    %c0_i32_0 = arith.constant 0 : i32
    return %c0_i32, %arg1 : i32, i32
  }
  func.func @transform_5(%arg0: i32, %arg1: i32) -> (i32, i32) {
    %c0_i32 = arith.constant 0 : i32
    return %arg0, %arg1 : i32, i32
  }
}

module attributes {stable_mosaic.version = 11 : i64} {
  func.func @_group_attn_kernel(%arg0: i32, %arg1: memref<1x2x8x16xbf16, #tpu.memory_space<vmem>>, %arg2: memref<1x2x8x16xbf16, #tpu.memory_space<vmem>>, %arg3: memref<1x2x8x16xbf16, #tpu.memory_space<vmem>>, %arg4: memref<1x2x8x16xbf16, #tpu.memory_space<vmem>>) attributes {dimension_semantics = [#tpu.dimension_semantics<parallel>], iteration_bounds = array<i64: 2>, scalar_prefetch = 0 : i64, scratch_operands = 0 : i64, tpu.core_type = #tpu.core_type<tc>, window_params = [{transform_indices = @transform_0, window_bounds = array<i64: 1, 2, 8, 16>}, {transform_indices = @transform_1, window_bounds = array<i64: 1, 2, 8, 16>}, {transform_indices = @transform_2, window_bounds = array<i64: 1, 2, 8, 16>}, {transform_indices = @transform_3, window_bounds = array<i64: 1, 2, 8, 16>}]} {
    %c0 = arith.constant 0 : index
    %c0_0 = arith.constant 0 : index
    %c0_1 = arith.constant 0 : index
    %c0_2 = arith.constant 0 : index
    %0 = vector.load %arg1[%c0, %c0_0, %c0_1, %c0_2] : memref<1x2x8x16xbf16, #tpu.memory_space<vmem>>, vector<1x2x8x16xbf16>
    %1 = arith.extf %0 : vector<1x2x8x16xbf16> to vector<1x2x8x16xf32>
    %2 = vector.shape_cast %1 : vector<1x2x8x16xf32> to vector<2x8x16xf32>
    %c0_3 = arith.constant 0 : index
    %c0_4 = arith.constant 0 : index
    %c0_5 = arith.constant 0 : index
    %c0_6 = arith.constant 0 : index
    %3 = vector.load %arg2[%c0_3, %c0_4, %c0_5, %c0_6] : memref<1x2x8x16xbf16, #tpu.memory_space<vmem>>, vector<1x2x8x16xbf16>
    %4 = arith.extf %3 : vector<1x2x8x16xbf16> to vector<1x2x8x16xf32>
    %5 = vector.shape_cast %4 : vector<1x2x8x16xf32> to vector<2x8x16xf32>
    %c0_7 = arith.constant 0 : index
    %c0_8 = arith.constant 0 : index
    %c0_9 = arith.constant 0 : index
    %c0_10 = arith.constant 0 : index
    %6 = vector.load %arg3[%c0_7, %c0_8, %c0_9, %c0_10] : memref<1x2x8x16xbf16, #tpu.memory_space<vmem>>, vector<1x2x8x16xbf16>
    %7 = arith.extf %6 : vector<1x2x8x16xbf16> to vector<1x2x8x16xf32>
    %8 = vector.shape_cast %7 : vector<1x2x8x16xf32> to vector<2x8x16xf32>
    %9 = vector.extract_strided_slice %2 {offsets = [0, 0, 0], sizes = [1, 8, 16], strides = [1, 1, 1]} : vector<2x8x16xf32> to vector<1x8x16xf32>
    %10 = vector.shape_cast %9 : vector<1x8x16xf32> to vector<8x16xf32>
    %11 = vector.extract_strided_slice %5 {offsets = [0, 0, 0], sizes = [1, 8, 16], strides = [1, 1, 1]} : vector<2x8x16xf32> to vector<1x8x16xf32>
    %12 = vector.shape_cast %11 : vector<1x8x16xf32> to vector<8x16xf32>
    %13 = arith.mulf %10, %12 : vector<8x16xf32>
    %cst = arith.constant dense<0.000000e+00> : vector<16xf32>
    %14 = vector.multi_reduction <add>, %13, %cst [0] : vector<8x16xf32> to vector<16xf32>
    %15 = vector.shape_cast %14 : vector<16xf32> to vector<1x16xf32>
    %cst_11 = arith.constant 0.353553385 : f32
    %16 = vector.broadcast %cst_11 : f32 to vector<1x16xf32>
    %17 = arith.mulf %15, %16 : vector<1x16xf32>
    %18 = vector.extract_strided_slice %5 {offsets = [1, 0, 0], sizes = [1, 8, 16], strides = [1, 1, 1]} : vector<2x8x16xf32> to vector<1x8x16xf32>
    %19 = vector.shape_cast %18 : vector<1x8x16xf32> to vector<8x16xf32>
    %20 = arith.mulf %10, %19 : vector<8x16xf32>
    %cst_12 = arith.constant dense<0.000000e+00> : vector<16xf32>
    %21 = vector.multi_reduction <add>, %20, %cst_12 [0] : vector<8x16xf32> to vector<16xf32>
    %22 = vector.shape_cast %21 : vector<16xf32> to vector<1x16xf32>
    %cst_13 = arith.constant 0.353553385 : f32
    %23 = vector.broadcast %cst_13 : f32 to vector<1x16xf32>
    %24 = arith.mulf %22, %23 : vector<1x16xf32>
    %25 = arith.maximumf %17, %24 : vector<1x16xf32>
    %26 = arith.subf %17, %25 : vector<1x16xf32>
    %27 = math.exp %26 : vector<1x16xf32>
    %28 = arith.subf %24, %25 : vector<1x16xf32>
    %29 = math.exp %28 : vector<1x16xf32>
    %30 = arith.addf %27, %29 : vector<1x16xf32>
    %cst_14 = arith.constant 1.000000e+00 : f32
    %31 = vector.broadcast %cst_14 : f32 to vector<1x16xf32>
    %32 = arith.divf %31, %30 : vector<1x16xf32>
    %33 = arith.mulf %27, %32 : vector<1x16xf32>
    %34 = vector.extract_strided_slice %8 {offsets = [0, 0, 0], sizes = [1, 8, 16], strides = [1, 1, 1]} : vector<2x8x16xf32> to vector<1x8x16xf32>
    %35 = vector.shape_cast %34 : vector<1x8x16xf32> to vector<8x16xf32>
    %36 = vector.broadcast %33 : vector<1x16xf32> to vector<8x16xf32>
    %37 = arith.mulf %36, %35 : vector<8x16xf32>
    %38 = arith.mulf %29, %32 : vector<1x16xf32>
    %39 = vector.extract_strided_slice %8 {offsets = [1, 0, 0], sizes = [1, 8, 16], strides = [1, 1, 1]} : vector<2x8x16xf32> to vector<1x8x16xf32>
    %40 = vector.shape_cast %39 : vector<1x8x16xf32> to vector<8x16xf32>
    %41 = vector.broadcast %38 : vector<1x16xf32> to vector<8x16xf32>
    %42 = arith.mulf %41, %40 : vector<8x16xf32>
    %43 = arith.addf %37, %42 : vector<8x16xf32>
    %cst_15 = arith.constant dense<0.000000e+00> : vector<8xf32>
    %44 = vector.multi_reduction <add>, %43, %cst_15 [1] : vector<8x16xf32> to vector<8xf32>
    %45 = vector.shape_cast %44 : vector<8xf32> to vector<8x1xf32>
    %cst_16 = arith.constant 5.000000e-01 : f32
    %46 = vector.broadcast %cst_16 : f32 to vector<8x1xf32>
    %47 = arith.divf %46, %45 : vector<8x1xf32>
    %48 = vector.broadcast %47 : vector<8x1xf32> to vector<8x16xf32>
    %49 = arith.mulf %43, %48 : vector<8x16xf32>
    %50 = vector.extract_strided_slice %2 {offsets = [1, 0, 0], sizes = [1, 8, 16], strides = [1, 1, 1]} : vector<2x8x16xf32> to vector<1x8x16xf32>
    %51 = vector.shape_cast %50 : vector<1x8x16xf32> to vector<8x16xf32>
    %52 = vector.extract_strided_slice %5 {offsets = [0, 0, 0], sizes = [1, 8, 16], strides = [1, 1, 1]} : vector<2x8x16xf32> to vector<1x8x16xf32>
    %53 = vector.shape_cast %52 : vector<1x8x16xf32> to vector<8x16xf32>
    %54 = arith.mulf %51, %53 : vector<8x16xf32>
    %cst_17 = arith.constant dense<0.000000e+00> : vector<16xf32>
    %55 = vector.multi_reduction <add>, %54, %cst_17 [0] : vector<8x16xf32> to vector<16xf32>
    %56 = vector.shape_cast %55 : vector<16xf32> to vector<1x16xf32>
    %cst_18 = arith.constant 0.353553385 : f32
    %57 = vector.broadcast %cst_18 : f32 to vector<1x16xf32>
    %58 = arith.mulf %56, %57 : vector<1x16xf32>
    %59 = vector.extract_strided_slice %5 {offsets = [1, 0, 0], sizes = [1, 8, 16], strides = [1, 1, 1]} : vector<2x8x16xf32> to vector<1x8x16xf32>
    %60 = vector.shape_cast %59 : vector<1x8x16xf32> to vector<8x16xf32>
    %61 = arith.mulf %51, %60 : vector<8x16xf32>
    %cst_19 = arith.constant dense<0.000000e+00> : vector<16xf32>
    %62 = vector.multi_reduction <add>, %61, %cst_19 [0] : vector<8x16xf32> to vector<16xf32>
    %63 = vector.shape_cast %62 : vector<16xf32> to vector<1x16xf32>
    %cst_20 = arith.constant 0.353553385 : f32
    %64 = vector.broadcast %cst_20 : f32 to vector<1x16xf32>
    %65 = arith.mulf %63, %64 : vector<1x16xf32>
    %66 = arith.maximumf %58, %65 : vector<1x16xf32>
    %67 = arith.subf %58, %66 : vector<1x16xf32>
    %68 = math.exp %67 : vector<1x16xf32>
    %69 = arith.subf %65, %66 : vector<1x16xf32>
    %70 = math.exp %69 : vector<1x16xf32>
    %71 = arith.addf %68, %70 : vector<1x16xf32>
    %cst_21 = arith.constant 1.000000e+00 : f32
    %72 = vector.broadcast %cst_21 : f32 to vector<1x16xf32>
    %73 = arith.divf %72, %71 : vector<1x16xf32>
    %74 = arith.mulf %68, %73 : vector<1x16xf32>
    %75 = vector.extract_strided_slice %8 {offsets = [0, 0, 0], sizes = [1, 8, 16], strides = [1, 1, 1]} : vector<2x8x16xf32> to vector<1x8x16xf32>
    %76 = vector.shape_cast %75 : vector<1x8x16xf32> to vector<8x16xf32>
    %77 = vector.broadcast %74 : vector<1x16xf32> to vector<8x16xf32>
    %78 = arith.mulf %77, %76 : vector<8x16xf32>
    %79 = arith.mulf %70, %73 : vector<1x16xf32>
    %80 = vector.extract_strided_slice %8 {offsets = [1, 0, 0], sizes = [1, 8, 16], strides = [1, 1, 1]} : vector<2x8x16xf32> to vector<1x8x16xf32>
    %81 = vector.shape_cast %80 : vector<1x8x16xf32> to vector<8x16xf32>
    %82 = vector.broadcast %79 : vector<1x16xf32> to vector<8x16xf32>
    %83 = arith.mulf %82, %81 : vector<8x16xf32>
    %84 = arith.addf %78, %83 : vector<8x16xf32>
    %cst_22 = arith.constant dense<0.000000e+00> : vector<8xf32>
    %85 = vector.multi_reduction <add>, %84, %cst_22 [1] : vector<8x16xf32> to vector<8xf32>
    %86 = vector.shape_cast %85 : vector<8xf32> to vector<8x1xf32>
    %cst_23 = arith.constant 5.000000e-01 : f32
    %87 = vector.broadcast %cst_23 : f32 to vector<8x1xf32>
    %88 = arith.divf %87, %86 : vector<8x1xf32>
    %89 = vector.broadcast %88 : vector<8x1xf32> to vector<8x16xf32>
    %90 = arith.mulf %84, %89 : vector<8x16xf32>
    %91 = vector.shape_cast %49 : vector<8x16xf32> to vector<1x8x16xf32>
    %92 = vector.shape_cast %90 : vector<8x16xf32> to vector<1x8x16xf32>
    %93 = tpu.concatenate %91, %92 in 0 : vector<1x8x16xf32>, vector<1x8x16xf32> -> vector<2x8x16xf32>
    %94 = arith.truncf %93 : vector<2x8x16xf32> to vector<2x8x16xbf16>
    %c0_24 = arith.constant 0 : index
    %c0_25 = arith.constant 0 : index
    %c0_26 = arith.constant 0 : index
    %c0_27 = arith.constant 0 : index
    %95 = vector.load %arg4[%c0_24, %c0_25, %c0_26, %c0_27] : memref<1x2x8x16xbf16, #tpu.memory_space<vmem>>, vector<1x2x8x16xbf16>
    %96 = vector.shape_cast %95 : vector<1x2x8x16xbf16> to vector<2x8x16xbf16>
    %97 = vector.shape_cast %94 : vector<2x8x16xbf16> to vector<1x2x8x16xbf16>
    tpu.vector_store %arg4[%c0_24, %c0_25, %c0_26, %c0_27], %97 {strides = array<i32>} : memref<1x2x8x16xbf16, #tpu.memory_space<vmem>>, vector<1x2x8x16xbf16>,
    return
  }
  func.func @transform_0(%arg0: i32) -> (i32, i32, i32, i32) {
    %c0_i32 = arith.constant 0 : i32
    %c0_i32_0 = arith.constant 0 : i32
    %c0_i32_1 = arith.constant 0 : i32
    %c0_i32_2 = arith.constant 0 : i32
    return %arg0, %c0_i32, %c0_i32_0, %c0_i32_1 : i32, i32, i32, i32
  }
  func.func @transform_1(%arg0: i32) -> (i32, i32, i32, i32) {
    %c0_i32 = arith.constant 0 : i32
    %c0_i32_0 = arith.constant 0 : i32
    %c0_i32_1 = arith.constant 0 : i32
    %c0_i32_2 = arith.constant 0 : i32
    return %arg0, %c0_i32, %c0_i32_0, %c0_i32_1 : i32, i32, i32, i32
  }
  func.func @transform_2(%arg0: i32) -> (i32, i32, i32, i32) {
    %c0_i32 = arith.constant 0 : i32
    %c0_i32_0 = arith.constant 0 : i32
    %c0_i32_1 = arith.constant 0 : i32
    %c0_i32_2 = arith.constant 0 : i32
    return %arg0, %c0_i32, %c0_i32_0, %c0_i32_1 : i32, i32, i32, i32
  }
  func.func @transform_3(%arg0: i32) -> (i32, i32, i32, i32) {
    %c0_i32 = arith.constant 0 : i32
    %c0_i32_0 = arith.constant 0 : i32
    %c0_i32_1 = arith.constant 0 : i32
    %c0_i32_2 = arith.constant 0 : i32
    return %arg0, %c0_i32, %c0_i32_0, %c0_i32_1 : i32, i32, i32, i32
  }
}

module attributes {stable_mosaic.version = 11 : i64} {
  func.func @_group_attn_kernel(%arg0: i32, %arg1: memref<1x2x8x8xbf16, #tpu.memory_space<vmem>>, %arg2: memref<1x2x8x8xbf16, #tpu.memory_space<vmem>>, %arg3: memref<1x2x8x8xbf16, #tpu.memory_space<vmem>>, %arg4: memref<1x2x8x8xbf16, #tpu.memory_space<vmem>>) attributes {dimension_semantics = [#tpu.dimension_semantics<parallel>], iteration_bounds = array<i64: 2>, scalar_prefetch = 0 : i64, scratch_operands = 0 : i64, tpu.core_type = #tpu.core_type<tc>, window_params = [{transform_indices = @transform_0, window_bounds = array<i64: 1, 2, 8, 8>}, {transform_indices = @transform_1, window_bounds = array<i64: 1, 2, 8, 8>}, {transform_indices = @transform_2, window_bounds = array<i64: 1, 2, 8, 8>}, {transform_indices = @transform_3, window_bounds = array<i64: 1, 2, 8, 8>}]} {
    %c0 = arith.constant 0 : index
    %c0_0 = arith.constant 0 : index
    %c0_1 = arith.constant 0 : index
    %c0_2 = arith.constant 0 : index
    %0 = vector.load %arg1[%c0, %c0_0, %c0_1, %c0_2] : memref<1x2x8x8xbf16, #tpu.memory_space<vmem>>, vector<1x2x8x8xbf16>
    %1 = arith.extf %0 : vector<1x2x8x8xbf16> to vector<1x2x8x8xf32>
    %2 = vector.shape_cast %1 : vector<1x2x8x8xf32> to vector<2x8x8xf32>
    %c0_3 = arith.constant 0 : index
    %c0_4 = arith.constant 0 : index
    %c0_5 = arith.constant 0 : index
    %c0_6 = arith.constant 0 : index
    %3 = vector.load %arg2[%c0_3, %c0_4, %c0_5, %c0_6] : memref<1x2x8x8xbf16, #tpu.memory_space<vmem>>, vector<1x2x8x8xbf16>
    %4 = arith.extf %3 : vector<1x2x8x8xbf16> to vector<1x2x8x8xf32>
    %5 = vector.shape_cast %4 : vector<1x2x8x8xf32> to vector<2x8x8xf32>
    %c0_7 = arith.constant 0 : index
    %c0_8 = arith.constant 0 : index
    %c0_9 = arith.constant 0 : index
    %c0_10 = arith.constant 0 : index
    %6 = vector.load %arg3[%c0_7, %c0_8, %c0_9, %c0_10] : memref<1x2x8x8xbf16, #tpu.memory_space<vmem>>, vector<1x2x8x8xbf16>
    %7 = arith.extf %6 : vector<1x2x8x8xbf16> to vector<1x2x8x8xf32>
    %8 = vector.shape_cast %7 : vector<1x2x8x8xf32> to vector<2x8x8xf32>
    %9 = vector.extract_strided_slice %2 {offsets = [0, 0, 0], sizes = [1, 8, 8], strides = [1, 1, 1]} : vector<2x8x8xf32> to vector<1x8x8xf32>
    %10 = vector.shape_cast %9 : vector<1x8x8xf32> to vector<8x8xf32>
    %11 = vector.extract_strided_slice %5 {offsets = [0, 0, 0], sizes = [1, 8, 8], strides = [1, 1, 1]} : vector<2x8x8xf32> to vector<1x8x8xf32>
    %12 = vector.shape_cast %11 : vector<1x8x8xf32> to vector<8x8xf32>
    %13 = arith.mulf %10, %12 : vector<8x8xf32>
    %cst = arith.constant dense<0.000000e+00> : vector<8xf32>
    %14 = vector.multi_reduction <add>, %13, %cst [0] : vector<8x8xf32> to vector<8xf32>
    %15 = vector.shape_cast %14 : vector<8xf32> to vector<1x8xf32>
    %cst_11 = arith.constant 0.353553385 : f32
    %16 = vector.broadcast %cst_11 : f32 to vector<1x8xf32>
    %17 = arith.mulf %15, %16 : vector<1x8xf32>
    %18 = vector.extract_strided_slice %5 {offsets = [1, 0, 0], sizes = [1, 8, 8], strides = [1, 1, 1]} : vector<2x8x8xf32> to vector<1x8x8xf32>
    %19 = vector.shape_cast %18 : vector<1x8x8xf32> to vector<8x8xf32>
    %20 = arith.mulf %10, %19 : vector<8x8xf32>
    %cst_12 = arith.constant dense<0.000000e+00> : vector<8xf32>
    %21 = vector.multi_reduction <add>, %20, %cst_12 [0] : vector<8x8xf32> to vector<8xf32>
    %22 = vector.shape_cast %21 : vector<8xf32> to vector<1x8xf32>
    %cst_13 = arith.constant 0.353553385 : f32
    %23 = vector.broadcast %cst_13 : f32 to vector<1x8xf32>
    %24 = arith.mulf %22, %23 : vector<1x8xf32>
    %25 = arith.maximumf %17, %24 : vector<1x8xf32>
    %26 = arith.subf %17, %25 : vector<1x8xf32>
    %27 = math.exp %26 : vector<1x8xf32>
    %28 = arith.subf %24, %25 : vector<1x8xf32>
    %29 = math.exp %28 : vector<1x8xf32>
    %30 = arith.addf %27, %29 : vector<1x8xf32>
    %cst_14 = arith.constant 1.000000e+00 : f32
    %31 = vector.broadcast %cst_14 : f32 to vector<1x8xf32>
    %32 = arith.divf %31, %30 : vector<1x8xf32>
    %33 = arith.mulf %27, %32 : vector<1x8xf32>
    %34 = vector.extract_strided_slice %8 {offsets = [0, 0, 0], sizes = [1, 8, 8], strides = [1, 1, 1]} : vector<2x8x8xf32> to vector<1x8x8xf32>
    %35 = vector.shape_cast %34 : vector<1x8x8xf32> to vector<8x8xf32>
    %36 = vector.broadcast %33 : vector<1x8xf32> to vector<8x8xf32>
    %37 = arith.mulf %36, %35 : vector<8x8xf32>
    %38 = arith.mulf %29, %32 : vector<1x8xf32>
    %39 = vector.extract_strided_slice %8 {offsets = [1, 0, 0], sizes = [1, 8, 8], strides = [1, 1, 1]} : vector<2x8x8xf32> to vector<1x8x8xf32>
    %40 = vector.shape_cast %39 : vector<1x8x8xf32> to vector<8x8xf32>
    %41 = vector.broadcast %38 : vector<1x8xf32> to vector<8x8xf32>
    %42 = arith.mulf %41, %40 : vector<8x8xf32>
    %43 = arith.addf %37, %42 : vector<8x8xf32>
    %cst_15 = arith.constant dense<0.000000e+00> : vector<8xf32>
    %44 = vector.multi_reduction <add>, %43, %cst_15 [1] : vector<8x8xf32> to vector<8xf32>
    %45 = vector.shape_cast %44 : vector<8xf32> to vector<8x1xf32>
    %cst_16 = arith.constant 5.000000e-01 : f32
    %46 = vector.broadcast %cst_16 : f32 to vector<8x1xf32>
    %47 = arith.divf %46, %45 : vector<8x1xf32>
    %48 = vector.broadcast %47 : vector<8x1xf32> to vector<8x8xf32>
    %49 = arith.mulf %43, %48 : vector<8x8xf32>
    %50 = vector.extract_strided_slice %2 {offsets = [1, 0, 0], sizes = [1, 8, 8], strides = [1, 1, 1]} : vector<2x8x8xf32> to vector<1x8x8xf32>
    %51 = vector.shape_cast %50 : vector<1x8x8xf32> to vector<8x8xf32>
    %52 = vector.extract_strided_slice %5 {offsets = [0, 0, 0], sizes = [1, 8, 8], strides = [1, 1, 1]} : vector<2x8x8xf32> to vector<1x8x8xf32>
    %53 = vector.shape_cast %52 : vector<1x8x8xf32> to vector<8x8xf32>
    %54 = arith.mulf %51, %53 : vector<8x8xf32>
    %cst_17 = arith.constant dense<0.000000e+00> : vector<8xf32>
    %55 = vector.multi_reduction <add>, %54, %cst_17 [0] : vector<8x8xf32> to vector<8xf32>
    %56 = vector.shape_cast %55 : vector<8xf32> to vector<1x8xf32>
    %cst_18 = arith.constant 0.353553385 : f32
    %57 = vector.broadcast %cst_18 : f32 to vector<1x8xf32>
    %58 = arith.mulf %56, %57 : vector<1x8xf32>
    %59 = vector.extract_strided_slice %5 {offsets = [1, 0, 0], sizes = [1, 8, 8], strides = [1, 1, 1]} : vector<2x8x8xf32> to vector<1x8x8xf32>
    %60 = vector.shape_cast %59 : vector<1x8x8xf32> to vector<8x8xf32>
    %61 = arith.mulf %51, %60 : vector<8x8xf32>
    %cst_19 = arith.constant dense<0.000000e+00> : vector<8xf32>
    %62 = vector.multi_reduction <add>, %61, %cst_19 [0] : vector<8x8xf32> to vector<8xf32>
    %63 = vector.shape_cast %62 : vector<8xf32> to vector<1x8xf32>
    %cst_20 = arith.constant 0.353553385 : f32
    %64 = vector.broadcast %cst_20 : f32 to vector<1x8xf32>
    %65 = arith.mulf %63, %64 : vector<1x8xf32>
    %66 = arith.maximumf %58, %65 : vector<1x8xf32>
    %67 = arith.subf %58, %66 : vector<1x8xf32>
    %68 = math.exp %67 : vector<1x8xf32>
    %69 = arith.subf %65, %66 : vector<1x8xf32>
    %70 = math.exp %69 : vector<1x8xf32>
    %71 = arith.addf %68, %70 : vector<1x8xf32>
    %cst_21 = arith.constant 1.000000e+00 : f32
    %72 = vector.broadcast %cst_21 : f32 to vector<1x8xf32>
    %73 = arith.divf %72, %71 : vector<1x8xf32>
    %74 = arith.mulf %68, %73 : vector<1x8xf32>
    %75 = vector.extract_strided_slice %8 {offsets = [0, 0, 0], sizes = [1, 8, 8], strides = [1, 1, 1]} : vector<2x8x8xf32> to vector<1x8x8xf32>
    %76 = vector.shape_cast %75 : vector<1x8x8xf32> to vector<8x8xf32>
    %77 = vector.broadcast %74 : vector<1x8xf32> to vector<8x8xf32>
    %78 = arith.mulf %77, %76 : vector<8x8xf32>
    %79 = arith.mulf %70, %73 : vector<1x8xf32>
    %80 = vector.extract_strided_slice %8 {offsets = [1, 0, 0], sizes = [1, 8, 8], strides = [1, 1, 1]} : vector<2x8x8xf32> to vector<1x8x8xf32>
    %81 = vector.shape_cast %80 : vector<1x8x8xf32> to vector<8x8xf32>
    %82 = vector.broadcast %79 : vector<1x8xf32> to vector<8x8xf32>
    %83 = arith.mulf %82, %81 : vector<8x8xf32>
    %84 = arith.addf %78, %83 : vector<8x8xf32>
    %cst_22 = arith.constant dense<0.000000e+00> : vector<8xf32>
    %85 = vector.multi_reduction <add>, %84, %cst_22 [1] : vector<8x8xf32> to vector<8xf32>
    %86 = vector.shape_cast %85 : vector<8xf32> to vector<8x1xf32>
    %cst_23 = arith.constant 5.000000e-01 : f32
    %87 = vector.broadcast %cst_23 : f32 to vector<8x1xf32>
    %88 = arith.divf %87, %86 : vector<8x1xf32>
    %89 = vector.broadcast %88 : vector<8x1xf32> to vector<8x8xf32>
    %90 = arith.mulf %84, %89 : vector<8x8xf32>
    %91 = vector.shape_cast %49 : vector<8x8xf32> to vector<1x8x8xf32>
    %92 = vector.shape_cast %90 : vector<8x8xf32> to vector<1x8x8xf32>
    %93 = tpu.concatenate %91, %92 in 0 : vector<1x8x8xf32>, vector<1x8x8xf32> -> vector<2x8x8xf32>
    %94 = arith.truncf %93 : vector<2x8x8xf32> to vector<2x8x8xbf16>
    %c0_24 = arith.constant 0 : index
    %c0_25 = arith.constant 0 : index
    %c0_26 = arith.constant 0 : index
    %c0_27 = arith.constant 0 : index
    %95 = vector.load %arg4[%c0_24, %c0_25, %c0_26, %c0_27] : memref<1x2x8x8xbf16, #tpu.memory_space<vmem>>, vector<1x2x8x8xbf16>
    %96 = vector.shape_cast %95 : vector<1x2x8x8xbf16> to vector<2x8x8xbf16>
    %97 = vector.shape_cast %94 : vector<2x8x8xbf16> to vector<1x2x8x8xbf16>
    tpu.vector_store %arg4[%c0_24, %c0_25, %c0_26, %c0_27], %97 {strides = array<i32>} : memref<1x2x8x8xbf16, #tpu.memory_space<vmem>>, vector<1x2x8x8xbf16>,
    return
  }
  func.func @transform_0(%arg0: i32) -> (i32, i32, i32, i32) {
    %c0_i32 = arith.constant 0 : i32
    %c0_i32_0 = arith.constant 0 : i32
    %c0_i32_1 = arith.constant 0 : i32
    %c0_i32_2 = arith.constant 0 : i32
    return %arg0, %c0_i32, %c0_i32_0, %c0_i32_1 : i32, i32, i32, i32
  }
  func.func @transform_1(%arg0: i32) -> (i32, i32, i32, i32) {
    %c0_i32 = arith.constant 0 : i32
    %c0_i32_0 = arith.constant 0 : i32
    %c0_i32_1 = arith.constant 0 : i32
    %c0_i32_2 = arith.constant 0 : i32
    return %arg0, %c0_i32, %c0_i32_0, %c0_i32_1 : i32, i32, i32, i32
  }
  func.func @transform_2(%arg0: i32) -> (i32, i32, i32, i32) {
    %c0_i32 = arith.constant 0 : i32
    %c0_i32_0 = arith.constant 0 : i32
    %c0_i32_1 = arith.constant 0 : i32
    %c0_i32_2 = arith.constant 0 : i32
    return %arg0, %c0_i32, %c0_i32_0, %c0_i32_1 : i32, i32, i32, i32
  }
  func.func @transform_3(%arg0: i32) -> (i32, i32, i32, i32) {
    %c0_i32 = arith.constant 0 : i32
    %c0_i32_0 = arith.constant 0 : i32
    %c0_i32_1 = arith.constant 0 : i32
    %c0_i32_2 = arith.constant 0 : i32
    return %arg0, %c0_i32, %c0_i32_0, %c0_i32_1 : i32, i32, i32, i32
  }
}

module attributes {stable_mosaic.version = 11 : i64} {
  func.func @_fused_linear_kernel(%arg0: i32, %arg1: i32, %arg2: memref<32x32xf32, #tpu.memory_space<vmem>>, %arg3: memref<1x32xf32, #tpu.memory_space<vmem>>, %arg4: memref<1x32xf32, #tpu.memory_space<vmem>>, %arg5: memref<32x32xbf16, #tpu.memory_space<vmem>>, %arg6: memref<1x32xf32, #tpu.memory_space<vmem>>, %arg7: memref<32x32xbf16, #tpu.memory_space<vmem>>) attributes {dimension_semantics = [#tpu.dimension_semantics<parallel>, #tpu.dimension_semantics<parallel>], iteration_bounds = array<i64: 1, 1>, scalar_prefetch = 0 : i64, scratch_operands = 0 : i64, tpu.core_type = #tpu.core_type<tc>, window_params = [{transform_indices = @transform_0, window_bounds = array<i64: 32, 32>}, {pipeline_mode = #tpu.pipeline_mode<synchronous>, transform_indices = @transform_1, window_bounds = array<i64: 1, 32>}, {pipeline_mode = #tpu.pipeline_mode<synchronous>, transform_indices = @transform_2, window_bounds = array<i64: 1, 32>}, {transform_indices = @transform_3, window_bounds = array<i64: 32, 32>}, {transform_indices = @transform_4, window_bounds = array<i64: 1, 32>}, {transform_indices = @transform_5, window_bounds = array<i64: 32, 32>}]} {
    %c0 = arith.constant 0 : index
    %c0_0 = arith.constant 0 : index
    %0 = vector.load %arg2[%c0, %c0_0] : memref<32x32xf32, #tpu.memory_space<vmem>>, vector<32x32xf32>
    %cst = arith.constant dense<0.000000e+00> : vector<32xf32>
    %1 = vector.multi_reduction <add>, %0, %cst [1] : vector<32x32xf32> to vector<32xf32>
    %2 = vector.shape_cast %1 : vector<32xf32> to vector<32x1xf32>
    %cst_1 = arith.constant 3.200000e+01 : f32
    %3 = vector.broadcast %cst_1 : f32 to vector<32x1xf32>
    %4 = arith.divf %2, %3 : vector<32x1xf32>
    %5 = vector.broadcast %4 : vector<32x1xf32> to vector<32x32xf32>
    %6 = arith.subf %0, %5 : vector<32x32xf32>
    %7 = arith.mulf %6, %6 : vector<32x32xf32>
    %cst_2 = arith.constant dense<0.000000e+00> : vector<32xf32>
    %8 = vector.multi_reduction <add>, %7, %cst_2 [1] : vector<32x32xf32> to vector<32xf32>
    %9 = vector.shape_cast %8 : vector<32xf32> to vector<32x1xf32>
    %cst_3 = arith.constant 3.200000e+01 : f32
    %10 = vector.broadcast %cst_3 : f32 to vector<32x1xf32>
    %11 = arith.divf %9, %10 : vector<32x1xf32>
    %cst_4 = arith.constant 9.99999974E-6 : f32
    %12 = vector.broadcast %cst_4 : f32 to vector<32x1xf32>
    %13 = arith.addf %11, %12 : vector<32x1xf32>
    %14 = math.rsqrt %13 : vector<32x1xf32>
    %15 = vector.broadcast %14 : vector<32x1xf32> to vector<32x32xf32>
    %16 = arith.mulf %6, %15 : vector<32x32xf32>
    %c0_5 = arith.constant 0 : index
    %c0_6 = arith.constant 0 : index
    %17 = vector.load %arg3[%c0_5, %c0_6] : memref<1x32xf32, #tpu.memory_space<vmem>>, vector<1x32xf32>
    %18 = vector.broadcast %17 : vector<1x32xf32> to vector<32x32xf32>
    %19 = arith.mulf %16, %18 : vector<32x32xf32>
    %c0_7 = arith.constant 0 : index
    %c0_8 = arith.constant 0 : index
    %20 = vector.load %arg4[%c0_7, %c0_8] : memref<1x32xf32, #tpu.memory_space<vmem>>, vector<1x32xf32>
    %21 = vector.broadcast %20 : vector<1x32xf32> to vector<32x32xf32>
    %22 = arith.addf %19, %21 : vector<32x32xf32>
    %23 = arith.truncf %22 : vector<32x32xf32> to vector<32x32xbf16>
    %c0_9 = arith.constant 0 : index
    %c0_10 = arith.constant 0 : index
    %24 = vector.load %arg5[%c0_9, %c0_10] : memref<32x32xbf16, #tpu.memory_space<vmem>>, vector<32x32xbf16>
    %cst_11 = arith.constant dense<0.000000e+00> : vector<32x32xf32>
    %25 = tpu.matmul %23, %24, %cst_11 {dimension_numbers = #tpu.dot_dimension_numbers<[1], [0], [0], [1], [0, 0, 1, 1], [], []>} : vector<32x32xbf16>, vector<32x32xbf16>, vector<32x32xf32> -> vector<32x32xf32>
    %c0_12 = arith.constant 0 : index
    %c0_13 = arith.constant 0 : index
    %26 = vector.load %arg6[%c0_12, %c0_13] : memref<1x32xf32, #tpu.memory_space<vmem>>, vector<1x32xf32>
    %27 = vector.broadcast %26 : vector<1x32xf32> to vector<32x32xf32>
    %28 = arith.addf %25, %27 : vector<32x32xf32>
    %29 = arith.truncf %28 : vector<32x32xf32> to vector<32x32xbf16>
    %c0_14 = arith.constant 0 : index
    %c0_15 = arith.constant 0 : index
    %30 = vector.load %arg7[%c0_14, %c0_15] : memref<32x32xbf16, #tpu.memory_space<vmem>>, vector<32x32xbf16>
    tpu.vector_store %arg7[%c0_14, %c0_15], %29 {strides = array<i32>} : memref<32x32xbf16, #tpu.memory_space<vmem>>, vector<32x32xbf16>,
    return
  }
  func.func @transform_0(%arg0: i32, %arg1: i32) -> (i32, i32) {
    %c0_i32 = arith.constant 0 : i32
    %c0_i32_0 = arith.constant 0 : i32
    return %arg0, %c0_i32 : i32, i32
  }
  func.func @transform_1(%arg0: i32, %arg1: i32) -> (i32, i32) {
    %c0_i32 = arith.constant 0 : i32
    %c0_i32_0 = arith.constant 0 : i32
    %c0_i32_1 = arith.constant 0 : i32
    return %c0_i32, %c0_i32_0 : i32, i32
  }
  func.func @transform_2(%arg0: i32, %arg1: i32) -> (i32, i32) {
    %c0_i32 = arith.constant 0 : i32
    %c0_i32_0 = arith.constant 0 : i32
    %c0_i32_1 = arith.constant 0 : i32
    return %c0_i32, %c0_i32_0 : i32, i32
  }
  func.func @transform_3(%arg0: i32, %arg1: i32) -> (i32, i32) {
    %c0_i32 = arith.constant 0 : i32
    %c0_i32_0 = arith.constant 0 : i32
    return %c0_i32, %arg1 : i32, i32
  }
  func.func @transform_4(%arg0: i32, %arg1: i32) -> (i32, i32) {
    %c0_i32 = arith.constant 0 : i32
    %c0_i32_0 = arith.constant 0 : i32
    return %c0_i32, %arg1 : i32, i32
  }
  func.func @transform_5(%arg0: i32, %arg1: i32) -> (i32, i32) {
    %c0_i32 = arith.constant 0 : i32
    return %arg0, %arg1 : i32, i32
  }
}

module attributes {stable_mosaic.version = 11 : i64} {
  func.func @_fused_linear_kernel(%arg0: i32, %arg1: i32, %arg2: memref<32x32xf32, #tpu.memory_space<vmem>>, %arg3: memref<32x64xbf16, #tpu.memory_space<vmem>>, %arg4: memref<1x64xf32, #tpu.memory_space<vmem>>, %arg5: memref<32x64xbf16, #tpu.memory_space<vmem>>) attributes {dimension_semantics = [#tpu.dimension_semantics<parallel>, #tpu.dimension_semantics<parallel>], iteration_bounds = array<i64: 1, 1>, scalar_prefetch = 0 : i64, scratch_operands = 0 : i64, tpu.core_type = #tpu.core_type<tc>, window_params = [{transform_indices = @transform_0, window_bounds = array<i64: 32, 32>}, {transform_indices = @transform_1, window_bounds = array<i64: 32, 64>}, {transform_indices = @transform_2, window_bounds = array<i64: 1, 64>}, {transform_indices = @transform_3, window_bounds = array<i64: 32, 64>}]} {
    %c0 = arith.constant 0 : index
    %c0_0 = arith.constant 0 : index
    %0 = vector.load %arg2[%c0, %c0_0] : memref<32x32xf32, #tpu.memory_space<vmem>>, vector<32x32xf32>
    %1 = arith.truncf %0 : vector<32x32xf32> to vector<32x32xbf16>
    %c0_1 = arith.constant 0 : index
    %c0_2 = arith.constant 0 : index
    %2 = vector.load %arg3[%c0_1, %c0_2] : memref<32x64xbf16, #tpu.memory_space<vmem>>, vector<32x64xbf16>
    %cst = arith.constant dense<0.000000e+00> : vector<32x64xf32>
    %3 = tpu.matmul %1, %2, %cst {dimension_numbers = #tpu.dot_dimension_numbers<[1], [0], [0], [1], [0, 0, 1, 1], [], []>} : vector<32x32xbf16>, vector<32x64xbf16>, vector<32x64xf32> -> vector<32x64xf32>
    %c0_3 = arith.constant 0 : index
    %c0_4 = arith.constant 0 : index
    %4 = vector.load %arg4[%c0_3, %c0_4] : memref<1x64xf32, #tpu.memory_space<vmem>>, vector<1x64xf32>
    %5 = vector.broadcast %4 : vector<1x64xf32> to vector<32x64xf32>
    %6 = arith.addf %3, %5 : vector<32x64xf32>
    %7 = arith.truncf %6 : vector<32x64xf32> to vector<32x64xbf16>
    %c0_5 = arith.constant 0 : index
    %c0_6 = arith.constant 0 : index
    %8 = vector.load %arg5[%c0_5, %c0_6] : memref<32x64xbf16, #tpu.memory_space<vmem>>, vector<32x64xbf16>
    tpu.vector_store %arg5[%c0_5, %c0_6], %7 {strides = array<i32>} : memref<32x64xbf16, #tpu.memory_space<vmem>>, vector<32x64xbf16>,
    return
  }
  func.func @transform_0(%arg0: i32, %arg1: i32) -> (i32, i32) {
    %c0_i32 = arith.constant 0 : i32
    %c0_i32_0 = arith.constant 0 : i32
    return %arg0, %c0_i32 : i32, i32
  }
  func.func @transform_1(%arg0: i32, %arg1: i32) -> (i32, i32) {
    %c0_i32 = arith.constant 0 : i32
    %c0_i32_0 = arith.constant 0 : i32
    return %c0_i32, %arg1 : i32, i32
  }
  func.func @transform_2(%arg0: i32, %arg1: i32) -> (i32, i32) {
    %c0_i32 = arith.constant 0 : i32
    %c0_i32_0 = arith.constant 0 : i32
    return %c0_i32, %arg1 : i32, i32
  }
  func.func @transform_3(%arg0: i32, %arg1: i32) -> (i32, i32) {
    %c0_i32 = arith.constant 0 : i32
    return %arg0, %arg1 : i32, i32
  }
}

module attributes {stable_mosaic.version = 11 : i64} {
  func.func @_fused_linear_kernel(%arg0: i32, %arg1: i32, %arg2: memref<32x32xbf16, #tpu.memory_space<vmem>>, %arg3: memref<32x32xbf16, #tpu.memory_space<vmem>>, %arg4: memref<1x32xf32, #tpu.memory_space<vmem>>, %arg5: memref<32x32xf32, #tpu.memory_space<vmem>>, %arg6: memref<32x32xf32, #tpu.memory_space<vmem>>) attributes {dimension_semantics = [#tpu.dimension_semantics<parallel>, #tpu.dimension_semantics<parallel>], iteration_bounds = array<i64: 1, 1>, scalar_prefetch = 0 : i64, scratch_operands = 0 : i64, tpu.core_type = #tpu.core_type<tc>, window_params = [{transform_indices = @transform_0, window_bounds = array<i64: 32, 32>}, {transform_indices = @transform_1, window_bounds = array<i64: 32, 32>}, {transform_indices = @transform_2, window_bounds = array<i64: 1, 32>}, {transform_indices = @transform_3, window_bounds = array<i64: 32, 32>}, {transform_indices = @transform_4, window_bounds = array<i64: 32, 32>}]} {
    %c0 = arith.constant 0 : index
    %c0_0 = arith.constant 0 : index
    %0 = vector.load %arg2[%c0, %c0_0] : memref<32x32xbf16, #tpu.memory_space<vmem>>, vector<32x32xbf16>
    %c0_1 = arith.constant 0 : index
    %c0_2 = arith.constant 0 : index
    %1 = vector.load %arg3[%c0_1, %c0_2] : memref<32x32xbf16, #tpu.memory_space<vmem>>, vector<32x32xbf16>
    %cst = arith.constant dense<0.000000e+00> : vector<32x32xf32>
    %2 = tpu.matmul %0, %1, %cst {dimension_numbers = #tpu.dot_dimension_numbers<[1], [0], [0], [1], [0, 0, 1, 1], [], []>} : vector<32x32xbf16>, vector<32x32xbf16>, vector<32x32xf32> -> vector<32x32xf32>
    %c0_3 = arith.constant 0 : index
    %c0_4 = arith.constant 0 : index
    %3 = vector.load %arg4[%c0_3, %c0_4] : memref<1x32xf32, #tpu.memory_space<vmem>>, vector<1x32xf32>
    %4 = vector.broadcast %3 : vector<1x32xf32> to vector<32x32xf32>
    %5 = arith.addf %2, %4 : vector<32x32xf32>
    %c0_5 = arith.constant 0 : index
    %c0_6 = arith.constant 0 : index
    %6 = vector.load %arg5[%c0_5, %c0_6] : memref<32x32xf32, #tpu.memory_space<vmem>>, vector<32x32xf32>
    %7 = arith.addf %5, %6 : vector<32x32xf32>
    %c0_7 = arith.constant 0 : index
    %c0_8 = arith.constant 0 : index
    %8 = vector.load %arg6[%c0_7, %c0_8] : memref<32x32xf32, #tpu.memory_space<vmem>>, vector<32x32xf32>
    tpu.vector_store %arg6[%c0_7, %c0_8], %7 {strides = array<i32>} : memref<32x32xf32, #tpu.memory_space<vmem>>, vector<32x32xf32>,
    return
  }
  func.func @transform_0(%arg0: i32, %arg1: i32) -> (i32, i32) {
    %c0_i32 = arith.constant 0 : i32
    %c0_i32_0 = arith.constant 0 : i32
    return %arg0, %c0_i32 : i32, i32
  }
  func.func @transform_1(%arg0: i32, %arg1: i32) -> (i32, i32) {
    %c0_i32 = arith.constant 0 : i32
    %c0_i32_0 = arith.constant 0 : i32
    return %c0_i32, %arg1 : i32, i32
  }
  func.func @transform_2(%arg0: i32, %arg1: i32) -> (i32, i32) {
    %c0_i32 = arith.constant 0 : i32
    %c0_i32_0 = arith.constant 0 : i32
    return %c0_i32, %arg1 : i32, i32
  }
  func.func @transform_3(%arg0: i32, %arg1: i32) -> (i32, i32) {
    %c0_i32 = arith.constant 0 : i32
    return %arg0, %arg1 : i32, i32
  }
  func.func @transform_4(%arg0: i32, %arg1: i32) -> (i32, i32) {
    %c0_i32 = arith.constant 0 : i32
    return %arg0, %arg1 : i32, i32
  }
}

module attributes {stable_mosaic.version = 11 : i64} {
  func.func @_fused_linear_kernel(%arg0: i32, %arg1: i32, %arg2: memref<32x32xbf16, #tpu.memory_space<vmem>>, %arg3: memref<1x32xf32, #tpu.memory_space<vmem>>, %arg4: memref<1x32xf32, #tpu.memory_space<vmem>>, %arg5: memref<32x32xbf16, #tpu.memory_space<vmem>>, %arg6: memref<1x32xf32, #tpu.memory_space<vmem>>, %arg7: memref<32x32xf32, #tpu.memory_space<vmem>>, %arg8: memref<32x32xf32, #tpu.memory_space<vmem>>) attributes {dimension_semantics = [#tpu.dimension_semantics<parallel>, #tpu.dimension_semantics<parallel>], iteration_bounds = array<i64: 1, 1>, scalar_prefetch = 0 : i64, scratch_operands = 0 : i64, tpu.core_type = #tpu.core_type<tc>, window_params = [{transform_indices = @transform_0, window_bounds = array<i64: 32, 32>}, {pipeline_mode = #tpu.pipeline_mode<synchronous>, transform_indices = @transform_1, window_bounds = array<i64: 1, 32>}, {pipeline_mode = #tpu.pipeline_mode<synchronous>, transform_indices = @transform_2, window_bounds = array<i64: 1, 32>}, {transform_indices = @transform_3, window_bounds = array<i64: 32, 32>}, {transform_indices = @transform_4, window_bounds = array<i64: 1, 32>}, {transform_indices = @transform_5, window_bounds = array<i64: 32, 32>}, {transform_indices = @transform_6, window_bounds = array<i64: 32, 32>}]} {
    %c0 = arith.constant 0 : index
    %c0_0 = arith.constant 0 : index
    %0 = vector.load %arg2[%c0, %c0_0] : memref<32x32xbf16, #tpu.memory_space<vmem>>, vector<32x32xbf16>
    %1 = arith.extf %0 : vector<32x32xbf16> to vector<32x32xf32>
    %cst = arith.constant dense<0.000000e+00> : vector<32xf32>
    %2 = vector.multi_reduction <add>, %1, %cst [1] : vector<32x32xf32> to vector<32xf32>
    %3 = vector.shape_cast %2 : vector<32xf32> to vector<32x1xf32>
    %cst_1 = arith.constant 3.200000e+01 : f32
    %4 = vector.broadcast %cst_1 : f32 to vector<32x1xf32>
    %5 = arith.divf %3, %4 : vector<32x1xf32>
    %6 = vector.broadcast %5 : vector<32x1xf32> to vector<32x32xf32>
    %7 = arith.subf %1, %6 : vector<32x32xf32>
    %8 = arith.mulf %7, %7 : vector<32x32xf32>
    %cst_2 = arith.constant dense<0.000000e+00> : vector<32xf32>
    %9 = vector.multi_reduction <add>, %8, %cst_2 [1] : vector<32x32xf32> to vector<32xf32>
    %10 = vector.shape_cast %9 : vector<32xf32> to vector<32x1xf32>
    %cst_3 = arith.constant 3.200000e+01 : f32
    %11 = vector.broadcast %cst_3 : f32 to vector<32x1xf32>
    %12 = arith.divf %10, %11 : vector<32x1xf32>
    %cst_4 = arith.constant 9.99999974E-6 : f32
    %13 = vector.broadcast %cst_4 : f32 to vector<32x1xf32>
    %14 = arith.addf %12, %13 : vector<32x1xf32>
    %15 = math.rsqrt %14 : vector<32x1xf32>
    %16 = vector.broadcast %15 : vector<32x1xf32> to vector<32x32xf32>
    %17 = arith.mulf %7, %16 : vector<32x32xf32>
    %c0_5 = arith.constant 0 : index
    %c0_6 = arith.constant 0 : index
    %18 = vector.load %arg3[%c0_5, %c0_6] : memref<1x32xf32, #tpu.memory_space<vmem>>, vector<1x32xf32>
    %19 = vector.broadcast %18 : vector<1x32xf32> to vector<32x32xf32>
    %20 = arith.mulf %17, %19 : vector<32x32xf32>
    %c0_7 = arith.constant 0 : index
    %c0_8 = arith.constant 0 : index
    %21 = vector.load %arg4[%c0_7, %c0_8] : memref<1x32xf32, #tpu.memory_space<vmem>>, vector<1x32xf32>
    %22 = vector.broadcast %21 : vector<1x32xf32> to vector<32x32xf32>
    %23 = arith.addf %20, %22 : vector<32x32xf32>
    %24 = arith.truncf %23 : vector<32x32xf32> to vector<32x32xbf16>
    %c0_9 = arith.constant 0 : index
    %c0_10 = arith.constant 0 : index
    %25 = vector.load %arg5[%c0_9, %c0_10] : memref<32x32xbf16, #tpu.memory_space<vmem>>, vector<32x32xbf16>
    %cst_11 = arith.constant dense<0.000000e+00> : vector<32x32xf32>
    %26 = tpu.matmul %24, %25, %cst_11 {dimension_numbers = #tpu.dot_dimension_numbers<[1], [0], [0], [1], [0, 0, 1, 1], [], []>} : vector<32x32xbf16>, vector<32x32xbf16>, vector<32x32xf32> -> vector<32x32xf32>
    %c0_12 = arith.constant 0 : index
    %c0_13 = arith.constant 0 : index
    %27 = vector.load %arg6[%c0_12, %c0_13] : memref<1x32xf32, #tpu.memory_space<vmem>>, vector<1x32xf32>
    %28 = vector.broadcast %27 : vector<1x32xf32> to vector<32x32xf32>
    %29 = arith.addf %26, %28 : vector<32x32xf32>
    %c0_14 = arith.constant 0 : index
    %c0_15 = arith.constant 0 : index
    %30 = vector.load %arg7[%c0_14, %c0_15] : memref<32x32xf32, #tpu.memory_space<vmem>>, vector<32x32xf32>
    %31 = arith.addf %29, %30 : vector<32x32xf32>
    %c0_16 = arith.constant 0 : index
    %c0_17 = arith.constant 0 : index
    %32 = vector.load %arg8[%c0_16, %c0_17] : memref<32x32xf32, #tpu.memory_space<vmem>>, vector<32x32xf32>
    tpu.vector_store %arg8[%c0_16, %c0_17], %31 {strides = array<i32>} : memref<32x32xf32, #tpu.memory_space<vmem>>, vector<32x32xf32>,
    return
  }
  func.func @transform_0(%arg0: i32, %arg1: i32) -> (i32, i32) {
    %c0_i32 = arith.constant 0 : i32
    %c0_i32_0 = arith.constant 0 : i32
    return %arg0, %c0_i32 : i32, i32
  }
  func.func @transform_1(%arg0: i32, %arg1: i32) -> (i32, i32) {
    %c0_i32 = arith.constant 0 : i32
    %c0_i32_0 = arith.constant 0 : i32
    %c0_i32_1 = arith.constant 0 : i32
    return %c0_i32, %c0_i32_0 : i32, i32
  }
  func.func @transform_2(%arg0: i32, %arg1: i32) -> (i32, i32) {
    %c0_i32 = arith.constant 0 : i32
    %c0_i32_0 = arith.constant 0 : i32
    %c0_i32_1 = arith.constant 0 : i32
    return %c0_i32, %c0_i32_0 : i32, i32
  }
  func.func @transform_3(%arg0: i32, %arg1: i32) -> (i32, i32) {
    %c0_i32 = arith.constant 0 : i32
    %c0_i32_0 = arith.constant 0 : i32
    return %c0_i32, %arg1 : i32, i32
  }
  func.func @transform_4(%arg0: i32, %arg1: i32) -> (i32, i32) {
    %c0_i32 = arith.constant 0 : i32
    %c0_i32_0 = arith.constant 0 : i32
    return %c0_i32, %arg1 : i32, i32
  }
  func.func @transform_5(%arg0: i32, %arg1: i32) -> (i32, i32) {
    %c0_i32 = arith.constant 0 : i32
    return %arg0, %arg1 : i32, i32
  }
  func.func @transform_6(%arg0: i32, %arg1: i32) -> (i32, i32) {
    %c0_i32 = arith.constant 0 : i32
    return %arg0, %arg1 : i32, i32
  }
}

module attributes {stable_mosaic.version = 11 : i64} {
  func.func @_fused_linear_kernel(%arg0: i32, %arg1: i32, %arg2: memref<32x32xf32, #tpu.memory_space<vmem>>, %arg3: memref<1x32xf32, #tpu.memory_space<vmem>>, %arg4: memref<1x32xf32, #tpu.memory_space<vmem>>, %arg5: memref<32x64xbf16, #tpu.memory_space<vmem>>, %arg6: memref<1x64xf32, #tpu.memory_space<vmem>>, %arg7: memref<32x64xbf16, #tpu.memory_space<vmem>>) attributes {dimension_semantics = [#tpu.dimension_semantics<parallel>, #tpu.dimension_semantics<parallel>], iteration_bounds = array<i64: 1, 1>, scalar_prefetch = 0 : i64, scratch_operands = 0 : i64, tpu.core_type = #tpu.core_type<tc>, window_params = [{transform_indices = @transform_0, window_bounds = array<i64: 32, 32>}, {pipeline_mode = #tpu.pipeline_mode<synchronous>, transform_indices = @transform_1, window_bounds = array<i64: 1, 32>}, {pipeline_mode = #tpu.pipeline_mode<synchronous>, transform_indices = @transform_2, window_bounds = array<i64: 1, 32>}, {transform_indices = @transform_3, window_bounds = array<i64: 32, 64>}, {transform_indices = @transform_4, window_bounds = array<i64: 1, 64>}, {transform_indices = @transform_5, window_bounds = array<i64: 32, 64>}]} {
    %c0 = arith.constant 0 : index
    %c0_0 = arith.constant 0 : index
    %0 = vector.load %arg2[%c0, %c0_0] : memref<32x32xf32, #tpu.memory_space<vmem>>, vector<32x32xf32>
    %cst = arith.constant dense<0.000000e+00> : vector<32xf32>
    %1 = vector.multi_reduction <add>, %0, %cst [1] : vector<32x32xf32> to vector<32xf32>
    %2 = vector.shape_cast %1 : vector<32xf32> to vector<32x1xf32>
    %cst_1 = arith.constant 3.200000e+01 : f32
    %3 = vector.broadcast %cst_1 : f32 to vector<32x1xf32>
    %4 = arith.divf %2, %3 : vector<32x1xf32>
    %5 = vector.broadcast %4 : vector<32x1xf32> to vector<32x32xf32>
    %6 = arith.subf %0, %5 : vector<32x32xf32>
    %7 = arith.mulf %6, %6 : vector<32x32xf32>
    %cst_2 = arith.constant dense<0.000000e+00> : vector<32xf32>
    %8 = vector.multi_reduction <add>, %7, %cst_2 [1] : vector<32x32xf32> to vector<32xf32>
    %9 = vector.shape_cast %8 : vector<32xf32> to vector<32x1xf32>
    %cst_3 = arith.constant 3.200000e+01 : f32
    %10 = vector.broadcast %cst_3 : f32 to vector<32x1xf32>
    %11 = arith.divf %9, %10 : vector<32x1xf32>
    %cst_4 = arith.constant 9.99999974E-6 : f32
    %12 = vector.broadcast %cst_4 : f32 to vector<32x1xf32>
    %13 = arith.addf %11, %12 : vector<32x1xf32>
    %14 = math.rsqrt %13 : vector<32x1xf32>
    %15 = vector.broadcast %14 : vector<32x1xf32> to vector<32x32xf32>
    %16 = arith.mulf %6, %15 : vector<32x32xf32>
    %c0_5 = arith.constant 0 : index
    %c0_6 = arith.constant 0 : index
    %17 = vector.load %arg3[%c0_5, %c0_6] : memref<1x32xf32, #tpu.memory_space<vmem>>, vector<1x32xf32>
    %18 = vector.broadcast %17 : vector<1x32xf32> to vector<32x32xf32>
    %19 = arith.mulf %16, %18 : vector<32x32xf32>
    %c0_7 = arith.constant 0 : index
    %c0_8 = arith.constant 0 : index
    %20 = vector.load %arg4[%c0_7, %c0_8] : memref<1x32xf32, #tpu.memory_space<vmem>>, vector<1x32xf32>
    %21 = vector.broadcast %20 : vector<1x32xf32> to vector<32x32xf32>
    %22 = arith.addf %19, %21 : vector<32x32xf32>
    %23 = arith.truncf %22 : vector<32x32xf32> to vector<32x32xbf16>
    %c0_9 = arith.constant 0 : index
    %c0_10 = arith.constant 0 : index
    %24 = vector.load %arg5[%c0_9, %c0_10] : memref<32x64xbf16, #tpu.memory_space<vmem>>, vector<32x64xbf16>
    %cst_11 = arith.constant dense<0.000000e+00> : vector<32x64xf32>
    %25 = tpu.matmul %23, %24, %cst_11 {dimension_numbers = #tpu.dot_dimension_numbers<[1], [0], [0], [1], [0, 0, 1, 1], [], []>} : vector<32x32xbf16>, vector<32x64xbf16>, vector<32x64xf32> -> vector<32x64xf32>
    %c0_12 = arith.constant 0 : index
    %c0_13 = arith.constant 0 : index
    %26 = vector.load %arg6[%c0_12, %c0_13] : memref<1x64xf32, #tpu.memory_space<vmem>>, vector<1x64xf32>
    %27 = vector.broadcast %26 : vector<1x64xf32> to vector<32x64xf32>
    %28 = arith.addf %25, %27 : vector<32x64xf32>
    %cst_14 = arith.constant 0.000000e+00 : f32
    %29 = vector.broadcast %cst_14 : f32 to vector<32x64xf32>
    %30 = arith.maximumf %28, %29 : vector<32x64xf32>
    %31 = arith.truncf %30 : vector<32x64xf32> to vector<32x64xbf16>
    %c0_15 = arith.constant 0 : index
    %c0_16 = arith.constant 0 : index
    %32 = vector.load %arg7[%c0_15, %c0_16] : memref<32x64xbf16, #tpu.memory_space<vmem>>, vector<32x64xbf16>
    tpu.vector_store %arg7[%c0_15, %c0_16], %31 {strides = array<i32>} : memref<32x64xbf16, #tpu.memory_space<vmem>>, vector<32x64xbf16>,
    return
  }
  func.func @transform_0(%arg0: i32, %arg1: i32) -> (i32, i32) {
    %c0_i32 = arith.constant 0 : i32
    %c0_i32_0 = arith.constant 0 : i32
    return %arg0, %c0_i32 : i32, i32
  }
  func.func @transform_1(%arg0: i32, %arg1: i32) -> (i32, i32) {
    %c0_i32 = arith.constant 0 : i32
    %c0_i32_0 = arith.constant 0 : i32
    %c0_i32_1 = arith.constant 0 : i32
    return %c0_i32, %c0_i32_0 : i32, i32
  }
  func.func @transform_2(%arg0: i32, %arg1: i32) -> (i32, i32) {
    %c0_i32 = arith.constant 0 : i32
    %c0_i32_0 = arith.constant 0 : i32
    %c0_i32_1 = arith.constant 0 : i32
    return %c0_i32, %c0_i32_0 : i32, i32
  }
  func.func @transform_3(%arg0: i32, %arg1: i32) -> (i32, i32) {
    %c0_i32 = arith.constant 0 : i32
    %c0_i32_0 = arith.constant 0 : i32
    return %c0_i32, %arg1 : i32, i32
  }
  func.func @transform_4(%arg0: i32, %arg1: i32) -> (i32, i32) {
    %c0_i32 = arith.constant 0 : i32
    %c0_i32_0 = arith.constant 0 : i32
    return %c0_i32, %arg1 : i32, i32
  }
  func.func @transform_5(%arg0: i32, %arg1: i32) -> (i32, i32) {
    %c0_i32 = arith.constant 0 : i32
    return %arg0, %arg1 : i32, i32
  }
}

module attributes {stable_mosaic.version = 11 : i64} {
  func.func @_fused_linear_kernel(%arg0: i32, %arg1: i32, %arg2: memref<32x64xbf16, #tpu.memory_space<vmem>>, %arg3: memref<1x64xf32, #tpu.memory_space<vmem>>, %arg4: memref<1x64xf32, #tpu.memory_space<vmem>>, %arg5: memref<64x32xbf16, #tpu.memory_space<vmem>>, %arg6: memref<1x32xf32, #tpu.memory_space<vmem>>, %arg7: memref<32x32xf32, #tpu.memory_space<vmem>>, %arg8: memref<32x32xf32, #tpu.memory_space<vmem>>) attributes {dimension_semantics = [#tpu.dimension_semantics<parallel>, #tpu.dimension_semantics<parallel>], iteration_bounds = array<i64: 1, 1>, scalar_prefetch = 0 : i64, scratch_operands = 0 : i64, tpu.core_type = #tpu.core_type<tc>, window_params = [{transform_indices = @transform_0, window_bounds = array<i64: 32, 64>}, {pipeline_mode = #tpu.pipeline_mode<synchronous>, transform_indices = @transform_1, window_bounds = array<i64: 1, 64>}, {pipeline_mode = #tpu.pipeline_mode<synchronous>, transform_indices = @transform_2, window_bounds = array<i64: 1, 64>}, {transform_indices = @transform_3, window_bounds = array<i64: 64, 32>}, {transform_indices = @transform_4, window_bounds = array<i64: 1, 32>}, {transform_indices = @transform_5, window_bounds = array<i64: 32, 32>}, {transform_indices = @transform_6, window_bounds = array<i64: 32, 32>}]} {
    %c0 = arith.constant 0 : index
    %c0_0 = arith.constant 0 : index
    %0 = vector.load %arg2[%c0, %c0_0] : memref<32x64xbf16, #tpu.memory_space<vmem>>, vector<32x64xbf16>
    %1 = arith.extf %0 : vector<32x64xbf16> to vector<32x64xf32>
    %cst = arith.constant dense<0.000000e+00> : vector<32xf32>
    %2 = vector.multi_reduction <add>, %1, %cst [1] : vector<32x64xf32> to vector<32xf32>
    %3 = vector.shape_cast %2 : vector<32xf32> to vector<32x1xf32>
    %cst_1 = arith.constant 6.400000e+01 : f32
    %4 = vector.broadcast %cst_1 : f32 to vector<32x1xf32>
    %5 = arith.divf %3, %4 : vector<32x1xf32>
    %6 = vector.broadcast %5 : vector<32x1xf32> to vector<32x64xf32>
    %7 = arith.subf %1, %6 : vector<32x64xf32>
    %8 = arith.mulf %7, %7 : vector<32x64xf32>
    %cst_2 = arith.constant dense<0.000000e+00> : vector<32xf32>
    %9 = vector.multi_reduction <add>, %8, %cst_2 [1] : vector<32x64xf32> to vector<32xf32>
    %10 = vector.shape_cast %9 : vector<32xf32> to vector<32x1xf32>
    %cst_3 = arith.constant 6.400000e+01 : f32
    %11 = vector.broadcast %cst_3 : f32 to vector<32x1xf32>
    %12 = arith.divf %10, %11 : vector<32x1xf32>
    %cst_4 = arith.constant 9.99999974E-6 : f32
    %13 = vector.broadcast %cst_4 : f32 to vector<32x1xf32>
    %14 = arith.addf %12, %13 : vector<32x1xf32>
    %15 = math.rsqrt %14 : vector<32x1xf32>
    %16 = vector.broadcast %15 : vector<32x1xf32> to vector<32x64xf32>
    %17 = arith.mulf %7, %16 : vector<32x64xf32>
    %c0_5 = arith.constant 0 : index
    %c0_6 = arith.constant 0 : index
    %18 = vector.load %arg3[%c0_5, %c0_6] : memref<1x64xf32, #tpu.memory_space<vmem>>, vector<1x64xf32>
    %19 = vector.broadcast %18 : vector<1x64xf32> to vector<32x64xf32>
    %20 = arith.mulf %17, %19 : vector<32x64xf32>
    %c0_7 = arith.constant 0 : index
    %c0_8 = arith.constant 0 : index
    %21 = vector.load %arg4[%c0_7, %c0_8] : memref<1x64xf32, #tpu.memory_space<vmem>>, vector<1x64xf32>
    %22 = vector.broadcast %21 : vector<1x64xf32> to vector<32x64xf32>
    %23 = arith.addf %20, %22 : vector<32x64xf32>
    %24 = arith.truncf %23 : vector<32x64xf32> to vector<32x64xbf16>
    %c0_9 = arith.constant 0 : index
    %c0_10 = arith.constant 0 : index
    %25 = vector.load %arg5[%c0_9, %c0_10] : memref<64x32xbf16, #tpu.memory_space<vmem>>, vector<64x32xbf16>
    %cst_11 = arith.constant dense<0.000000e+00> : vector<32x32xf32>
    %26 = tpu.matmul %24, %25, %cst_11 {dimension_numbers = #tpu.dot_dimension_numbers<[1], [0], [0], [1], [0, 0, 1, 1], [], []>} : vector<32x64xbf16>, vector<64x32xbf16>, vector<32x32xf32> -> vector<32x32xf32>
    %c0_12 = arith.constant 0 : index
    %c0_13 = arith.constant 0 : index
    %27 = vector.load %arg6[%c0_12, %c0_13] : memref<1x32xf32, #tpu.memory_space<vmem>>, vector<1x32xf32>
    %28 = vector.broadcast %27 : vector<1x32xf32> to vector<32x32xf32>
    %29 = arith.addf %26, %28 : vector<32x32xf32>
    %c0_14 = arith.constant 0 : index
    %c0_15 = arith.constant 0 : index
    %30 = vector.load %arg7[%c0_14, %c0_15] : memref<32x32xf32, #tpu.memory_space<vmem>>, vector<32x32xf32>
    %31 = arith.addf %29, %30 : vector<32x32xf32>
    %c0_16 = arith.constant 0 : index
    %c0_17 = arith.constant 0 : index
    %32 = vector.load %arg8[%c0_16, %c0_17] : memref<32x32xf32, #tpu.memory_space<vmem>>, vector<32x32xf32>
    tpu.vector_store %arg8[%c0_16, %c0_17], %31 {strides = array<i32>} : memref<32x32xf32, #tpu.memory_space<vmem>>, vector<32x32xf32>,
    return
  }
  func.func @transform_0(%arg0: i32, %arg1: i32) -> (i32, i32) {
    %c0_i32 = arith.constant 0 : i32
    %c0_i32_0 = arith.constant 0 : i32
    return %arg0, %c0_i32 : i32, i32
  }
  func.func @transform_1(%arg0: i32, %arg1: i32) -> (i32, i32) {
    %c0_i32 = arith.constant 0 : i32
    %c0_i32_0 = arith.constant 0 : i32
    %c0_i32_1 = arith.constant 0 : i32
    return %c0_i32, %c0_i32_0 : i32, i32
  }
  func.func @transform_2(%arg0: i32, %arg1: i32) -> (i32, i32) {
    %c0_i32 = arith.constant 0 : i32
    %c0_i32_0 = arith.constant 0 : i32
    %c0_i32_1 = arith.constant 0 : i32
    return %c0_i32, %c0_i32_0 : i32, i32
  }
  func.func @transform_3(%arg0: i32, %arg1: i32) -> (i32, i32) {
    %c0_i32 = arith.constant 0 : i32
    %c0_i32_0 = arith.constant 0 : i32
    return %c0_i32, %arg1 : i32, i32
  }
  func.func @transform_4(%arg0: i32, %arg1: i32) -> (i32, i32) {
    %c0_i32 = arith.constant 0 : i32
    %c0_i32_0 = arith.constant 0 : i32
    return %c0_i32, %arg1 : i32, i32
  }
  func.func @transform_5(%arg0: i32, %arg1: i32) -> (i32, i32) {
    %c0_i32 = arith.constant 0 : i32
    return %arg0, %arg1 : i32, i32
  }
  func.func @transform_6(%arg0: i32, %arg1: i32) -> (i32, i32) {
    %c0_i32 = arith.constant 0 : i32
    return %arg0, %arg1 : i32, i32
  }
}

</mosaic_0001>

<bundles_post_ra>
// kernel: dilated_transformer_decoder_layer.11
= control target key start
LH: loop header
LB: loop body
LE: loop exit
PB: predicated region body
PF: predicated region fallthrough
CT: control target
= control target key end

     0   :  { %vm25_vm0 = vcmask 261120   ;;  %v225_v8 = vmov 32.0   ;;  %vm188_vm14 = vcmask 781312   ;;  %s325_s0 = inlined_call_operand.vmem [shape: f32[32,32], index: 0, kind: input, shape index: {}]   ;;  %s326_s1 = inlined_call_operand.vmem [shape: f32[1,32], index: 1, kind: input, shape index: {}]   ;;  %s327_s2 = inlined_call_operand.vmem [shape: f32[1,32], index: 2, kind: input, shape index: {}]   ;;  %s328_s4 = inlined_call_operand.vmem [shape: f32[1,96], index: 4, kind: input, shape index: {}]   ;;  %s329_s3 = inlined_call_operand.vmem [shape: bf16[32,96], index: 3, kind: input, shape index: {}]   ;;  %s330_s5 = inlined_call_operand.vmem [shape: bf16[32,96], index: 5, kind: output, shape index: {}]  }
   0x1   :  { %v23_v0 = vld [vmem:[%s325_s0 + $0x10] sm:$0xff]  ;;  %v21_v1 = vld [vmem:[%s325_s0] sm:$0xff]  ;;  %v24_v4 = vld [vmem:[%s325_s0 + $0x18] sm:$0xff]  ;;  %215 = vrcp.f32 %v225_v8 }
   0x2   :  { %v32_v2 = vsel %vm25_vm0, %v23_v0, 0.0  ;;  %v26_v3 = vsel %vm25_vm0, %v21_v1, 0.0  ;;  %v22_v5 = vld [vmem:[%s325_s0 + $0x8] sm:$0xff]  ;;  %v35_v6 = vsel %vm25_vm0, %v24_v4, 0.0  ;;  %v207_v40 = vld [vmem:[%s329_s3] sm:$0xff] }
   0x3   :  { %33 = vadd.xlane.f32.xlu1 %v32_v2  ;;  %27 = vadd.xlane.f32.xlu0 %v26_v3  ;;  %v29_v7 = vsel %vm25_vm0, %v22_v5, 0.0  ;;  %v208_v35 = vld [vmem:[%s329_s3 + $0x8] sm:$0xff] }
   0x4   :  { %171 = vmatpush.bf16.msra.mxu0 %v208_v35  ;;  %209 = vmatpush.bf16.msra.mxu1 %v208_v35 }
   0x7   :  { %v216_v9 = vpop.eup %215 }
   0x8   :  { %v39_v10 = vmul.f32 32.0, %v216_v9  ;;  %vm43_vm1 = vweird.f32 %v216_v9  ;;  %172 = vmatpush.bf16.msra.mxu0 %v207_v40  ;;  %210 = vmatpush.bf16.msra.mxu1 %v207_v40 }
   0xa   :  { %v40_v11 = vsub.f32 1.0, %v39_v10  ;;  %v212_v10 = vld [vmem:[%s326_s1] ss:$0 sm:$0xff] }
   0xb   :  { %36 = vadd.xlane.f32.xlu1 %v35_v6  ;;  %30 = vadd.xlane.f32.xlu0 %v29_v7 }
   0xc   :  { %v41_v12 = vmul.f32 %v216_v9, %v40_v11 }
   0xe   :  { %v42_v13 = vadd.f32 %v216_v9, %v41_v12 }
  0x10   :  { %v44_v14 = vsel %vm43_vm1, %v216_v9, %v42_v13 }
  0x76   :  { %v34_v15 = vpop.xlane.xlu1 %33  ;;  %v28_v16 = vpop.xlane.xlu0 %27 }
  0x77   :  { %v47_v17 = vmul.f32 %v44_v14, %v34_v15  ;;  %v45_v18 = vmul.f32 %v44_v14, %v28_v16 }
  0x79   :  { %v272_v19 = vsub.f32 %v23_v0, %v47_v17  ;;  %v274_v20 = vsub.f32 %v21_v1, %v45_v18  ;;  %v213_v17 = vld [vmem:[%s327_s2] ss:$0 sm:$0xff] }
  0x7b   :  { %v55_v21 = vmul.f32 %v272_v19, %v272_v19  ;;  %v53_v22 = vmul.f32 %v274_v20, %v274_v20 }
  0x7d   :  { %v63_v23 = vsel %vm25_vm0, %v55_v21, 0.0  ;;  %v57_v24 = vsel %vm25_vm0, %v53_v22, 0.0 }
  0x7e   :  { %v37_v25 = vpop.xlane.xlu1 %36  ;;  %64 = vadd.xlane.f32.xlu0 %v63_v23  ;;  %58 = vadd.xlane.f32.xlu2 %v57_v24  ;;  %v31_v26 = vpop.xlane.xlu0 %30 }
  0x7f   :  { %v48_v27 = vmul.f32 %v44_v14, %v37_v25  ;;  %v46_v28 = vmul.f32 %v44_v14, %v31_v26 }
  0x81   :  { %v282_v29 = vsub.f32 %v24_v4, %v48_v27  ;;  %v284_v30 = vsub.f32 %v22_v5, %v46_v28 }
  0x83   :  { %v56_v31 = vmul.f32 %v282_v29, %v282_v29  ;;  %v54_v32 = vmul.f32 %v284_v30, %v284_v30 }
  0x85   :  { %v66_v33 = vsel %vm25_vm0, %v56_v31, 0.0  ;;  %v60_v34 = vsel %vm25_vm0, %v54_v32, 0.0 }
  0x86   :  { %67 = vadd.xlane.f32.xlu1 %v66_v33  ;;  %61 = vadd.xlane.f32.xlu2 %v60_v34 }
  0xf1   :  { %v59_v36 = vpop.xlane.xlu2 %58  ;;  %v65_v37 = vpop.xlane.xlu0 %64 }
  0xf2   :  { %v69_v38 = vmul.f32 %v59_v36, %v44_v14  ;;  %v71_v39 = vmul.f32 %v65_v37, %v44_v14 }
  0xf4   :  { %v73_v41 = vadd.f32 1e-05, %v69_v38  ;;  %v75_v42 = vadd.f32 1e-05, %v71_v39 }
  0xf6   :  { %217 = vrsqrt.f32 %v73_v41  ;;  %vm103_vm4 = vweird.f32 %v75_v42  ;;  %vm83_vm5 = vweird.f32 %v73_v41 }
  0xf7   :  { %219 = vrsqrt.f32 %v75_v42 }
  0xf9   :  { %v68_v43 = vpop.xlane.xlu1 %67  ;;  %v62_v44 = vpop.xlane.xlu2 %61 }
  0xfa   :  { %v72_v45 = vmul.f32 %v68_v43, %v44_v14  ;;  %v70_v46 = vmul.f32 %v62_v44, %v44_v14 }
  0xfc   :  { %v218_v47 = vpop.eup %217  ;;  %v76_v48 = vadd.f32 1e-05, %v72_v45  ;;  %v74_v49 = vadd.f32 1e-05, %v70_v46 }
  0xfd   :  { %v220_v50 = vpop.eup %219  ;;  %v78_v51 = vmul.f32 %v218_v47, %v73_v41  ;;  %vm84_vm3 = vweird.f32 %v218_v47 }
  0xfe   :  { %v98_v52 = vmul.f32 %v220_v50, %v75_v42  ;;  %221 = vrsqrt.f32 %v76_v48  ;;  %vm104_vm2 = vweird.f32 %v220_v50  ;;  %vm85_vm7 = vmor %vm83_vm5, %vm84_vm3  ;;  %vm113_vm10 = vweird.f32 %v76_v48 }
  0xff   :  { %v79_v53 = vmul.f32 %v218_v47, %v78_v51  ;;  %223 = vrsqrt.f32 %v74_v49  ;;  %vm105_vm6 = vmor %vm103_vm4, %vm104_vm2  ;;  %vm93_vm12 = vweird.f32 %v74_v49 }
 0x100   :  { %v99_v54 = vmul.f32 %v220_v50, %v98_v52 }
 0x101   :  { %v80_v55 = vmul.f32 0.5, %v79_v53 }
 0x102   :  { %v100_v56 = vmul.f32 0.5, %v99_v54 }
 0x103   :  { %v81_v57 = vsub.f32 1.5, %v80_v55 }
 0x104   :  { %v222_v58 = vpop.eup %221  ;;  %v101_v59 = vsub.f32 1.5, %v100_v56 }
 0x105   :  { %v224_v60 = vpop.eup %223  ;;  %v108_v61 = vmul.f32 %v222_v58, %v76_v48  ;;  %v82_v62 = vmul.f32 %v218_v47, %v81_v57  ;;  %vm114_vm8 = vweird.f32 %v222_v58 }
 0x106   :  { %v102_v63 = vmul.f32 %v220_v50, %v101_v59  ;;  %v88_v0 = vmul.f32 %v224_v60, %v74_v49  ;;  %vm94_vm9 = vweird.f32 %v224_v60  ;;  %vm115_vm11 = vmor %vm113_vm10, %vm114_vm8 }
 0x107   :  { %v109_v1 = vmul.f32 %v222_v58, %v108_v61  ;;  %v86_v5 = vsel %vm85_vm7, %v218_v47, %v82_v62  ;;  %vm95_vm13 = vmor %vm93_vm12, %vm94_vm9 }
 0x108   :  { %v89_v2 = vmul.f32 %v224_v60, %v88_v0  ;;  %v106_v3 = vsel %vm105_vm6, %v220_v50, %v102_v63  ;;  %v117_v11 = vmul.f32 %v86_v5, %v274_v20 }
 0x109   :  { %v110_v4 = vmul.f32 0.5, %v109_v1  ;;  %v119_v8 = vmul.f32 %v106_v3, %v272_v19 }
 0x10a   :  { %v90_v6 = vmul.f32 0.5, %v89_v2  ;;  %v125_v21 = vmul.f32 %v212_v10, %v117_v11 }
 0x10b   :  { %v111_v7 = vsub.f32 1.5, %v110_v4  ;;  %v127_v18 = vmul.f32 %v212_v10, %v119_v8 }
 0x10c   :  { %v91_v9 = vsub.f32 1.5, %v90_v6  ;;  %v133_v25 = vadd.f32 %v213_v17, %v125_v21 }
 0x10d   :  { %v112_v12 = vmul.f32 %v222_v58, %v111_v7  ;;  %v135_v23 = vadd.f32 %v213_v17, %v127_v18 }
 0x10e   :  { %v92_v13 = vmul.f32 %v224_v60, %v91_v9 }
 0x10f   :  { %v116_v14 = vsel %vm115_vm11, %v222_v58, %v112_v12 }
 0x110   :  { %v120_v15 = vmul.f32 %v116_v14, %v282_v29  ;;  %v96_v16 = vsel %vm95_vm13, %v224_v60, %v92_v13  ;;  %v214_v29 = vld [vmem:[%s328_s4] ss:$0 sm:$0xff] }
 0x111   :  { %v118_v19 = vmul.f32 %v96_v16, %v284_v30 }
 0x112   :  { %v128_v22 = vmul.f32 %v212_v10, %v120_v15 }
 0x113   :  { %v126_v20 = vmul.f32 %v212_v10, %v118_v19 }
 0x114   :  { %v136_v24 = vadd.f32 %v213_v17, %v128_v22 }
 0x115   :  { %v134_v26 = vadd.f32 %v213_v17, %v126_v20 }
 0x116   :  { %v138_v27 = vpack.c.bf16 %v136_v24, %v135_v23 }
 0x117   :  { %v137_v28 = vpack.c.bf16 %v134_v26, %v133_v25 }
 0x118   :  { %206 = vmatmul.msk.bf16.vlgmr.msra.gmra.mxu1 %vm25_vm0, %v138_v27 }
 0x119   :  { %205 = vmatmul.msk.bf16.vlgmr.msra.gmra.mxu0 %vm25_vm0, %v137_v28 }
 0x195   :  { %v179_v31 = vpop.f32.mrf.mxu1 }
 0x196   :  { %v174_v32 = vpop.f32.mrf.mxu0  ;;  %v180_v30 = vadd.f32 %v214_v29, %v179_v31 }
 0x197   :  { %v175_v33 = vadd.f32 %v214_v29, %v174_v32 }
 0x198   :  { %v186_v34 = vpack.c.bf16 %v180_v30, %v180_v30 }
 0x199   :  { %v184_v35 = vpack.c.bf16 %v175_v33, %v175_v33 }
 0x19a   :  { %191 = vst.msk [vmem:[%s330_s5 + $0x8] sm:$0xf] %vm188_vm14, %v186_v34 }
 0x19b   :  { %189 = vst.msk [vmem:[%s330_s5] sm:$0xf] %vm188_vm14, %v184_v35 }
 0x19d   :  { %v181_v36 = vpop.f32.mrf.mxu1 }
 0x19e   :  { %v176_v37 = vpop.f32.mrf.mxu0  ;;  %v182_v38 = vadd.f32 %v214_v29, %v181_v36 }
 0x19f   :  { %v177_v39 = vadd.f32 %v214_v29, %v176_v37 }
 0x1a0   :  { %v187_v40 = vpack.c.bf16 %v182_v38, %v182_v38 }
 0x1a1   :  { %v185_v41 = vpack.c.bf16 %v177_v39, %v177_v39 }
 0x1a2   :  { %192 = vst.msk [vmem:[%s330_s5 + $0xc] sm:$0xf] %vm188_vm14, %v187_v40 }
 0x1a3   :  { %190 = vst.msk [vmem:[%s330_s5 + $0x4] sm:$0xf] %vm188_vm14, %v185_v41 }

// kernel: dilated_transformer_decoder_layer.12
= control target key start
LH: loop header
LB: loop body
LE: loop exit
PB: predicated region body
PF: predicated region fallthrough
CT: control target
= control target key end

     0   :  { %s521_s12 = smov 0   ;;  %s556_s0 = inlined_call_operand.vmem [shape: bf16[2,2,8,16], index: 0, kind: input, shape index: {}]   ;;  %s557_s1 = inlined_call_operand.vmem [shape: bf16[2,2,8,16], index: 1, kind: input, shape index: {}]   ;;  %s558_s2 = inlined_call_operand.vmem [shape: bf16[2,2,8,16], index: 2, kind: input, shape index: {}]   ;;  %s559_s3 = inlined_call_operand.vmem [shape: bf16[2,2,8,16], index: 3, kind: output, shape index: {}]  }
   0x1 LB: > { %s438_s13 = sadd.s32 4294967295, %s499_s12   ;;  %p442_p0 = scmp.ge.s32.totalorder %s499_s12, 1  ;;  %s499_s12 = sphi %s521_s12, %s13_s12  }
   0x2   : > { %p157_p1 = scmp.lt.s32.totalorder %s499_s12, 3 }
   0x4   : > { %p158_p2 = pnand %p442_p0, %p157_p1 }
   0x5   : > { %p191_p3 = scmp.lt.s32.totalorder (!%p158_p2), %s438_s13, 1 }
   0x6   : > { %161 = sbr.rel (%p158_p2) target bundleno = 223 (0xdf), region = 32 }
   0xb   : > { %s561_s13 = smov (!%p191_p3, %s438_s13), 1  ;;  %vm224_vm0 = vcmask 130048   ;;  %vm356_vm14 = vcmask 125952  }
   0xc   : > { %s529_s14 = sshll.u32 %s561_s13, 3 }
   0xd   : > { %s195_s17 = scalar_lea.vmem %s556_s0, %s529_s14  ;;  %s200_s20 = scalar_lea.vmem %s557_s1, %s529_s14 }
   0xe   : > { %v458_v0 = vld [vmem:[%s195_s17] sm:$0xff]   ;;  %s205_s23 = scalar_lea.vmem %s558_s2, %s529_s14  ;;  %s210_s26 = scalar_lea.vmem %s559_s3, %s529_s14 }
   0xf   : > { %v462_v1 = vld [vmem:[%s200_s20] sm:$0xff]   ;;  %v459_v2 = vunpack.c.l.bf16 %v458_v0  ;;  %v460_v3 = vunpack.c.h.bf16 %v458_v0 }
  0x10   : > { %v463_v4 = vunpack.c.l.bf16 %v462_v1  ;;  %v464_v5 = vunpack.c.h.bf16 %v462_v1 }
  0x12   : > { %v223_v6 = vmul.f32 %v463_v4, %v459_v2  ;;  %v233_v7 = vmul.f32 %v464_v5, %v459_v2  ;;  %v289_v8 = vmul.f32 %v463_v4, %v460_v3  ;;  %v298_v9 = vmul.f32 %v464_v5, %v460_v3  ;;  %v466_v4 = vld [vmem:[%s205_s23] sm:$0xff]  }
  0x14   : > { %v225_v10 = vsel %vm224_vm0, %v223_v6, 0.0  ;;  %v234_v11 = vsel %vm224_vm0, %v233_v7, 0.0  ;;  %v290_v12 = vsel %vm224_vm0, %v289_v8, 0.0  ;;  %v299_v13 = vsel %vm224_vm0, %v298_v9, 0.0 }
  0x15   : > { %v226_v14 = vrot.slane %v225_v10, 4  ;;  %v235_v15 = vrot.slane %v234_v11, 4  ;;  %v291_v16 = vrot.slane %v290_v12, 4  ;;  %v300_v17 = vrot.slane %v299_v13, 4 }
  0x16   : > { %v467_v9 = vunpack.c.l.bf16 %v466_v4 }
  0x17   : > { %v227_v18 = vadd.f32 %v226_v14, %v225_v10  ;;  %v236_v19 = vadd.f32 %v235_v15, %v234_v11  ;;  %v292_v20 = vadd.f32 %v291_v16, %v290_v12  ;;  %v301_v21 = vadd.f32 %v300_v17, %v299_v13 }
  0x18   : > { %v468_v10 = vunpack.c.h.bf16 %v466_v4 }
  0x19   : > { %v228_v22 = vrot.slane %v227_v18, 2  ;;  %v237_v23 = vrot.slane %v236_v19, 2  ;;  %v293_v24 = vrot.slane %v292_v20, 2  ;;  %v302_v25 = vrot.slane %v301_v21, 2 }
  0x1b   : > { %v229_v26 = vadd.f32 %v228_v22, %v227_v18  ;;  %v238_v27 = vadd.f32 %v237_v23, %v236_v19  ;;  %v294_v28 = vadd.f32 %v293_v24, %v292_v20  ;;  %v303_v29 = vadd.f32 %v302_v25, %v301_v21 }
  0x1d   : > { %v230_v30 = vrot.slane %v229_v26, 1  ;;  %v239_v31 = vrot.slane %v238_v27, 1  ;;  %v295_v32 = vrot.slane %v294_v28, 1  ;;  %v304_v33 = vrot.slane %v303_v29, 1 }
  0x1f   : > { %v231_v34 = vadd.f32 %v230_v30, %v229_v26  ;;  %v240_v35 = vadd.f32 %v239_v31, %v238_v27  ;;  %v296_v36 = vadd.f32 %v295_v32, %v294_v28  ;;  %v305_v37 = vadd.f32 %v304_v33, %v303_v29 }
  0x21   : > { %v232_v38 = vmul.f32 0.35355338, %v231_v34  ;;  %v241_v39 = vmul.f32 0.35355338, %v240_v35  ;;  %v297_v40 = vmul.f32 0.35355338, %v296_v36 }
  0x22   : > { %v306_v41 = vmul.f32 0.35355338, %v305_v37 }
  0x23   : > { %v242_v42 = vmax.f32 %v232_v38, %v241_v39 }
  0x24   : > { %v307_v43 = vmax.f32 %v297_v40, %v306_v41 }
  0x25   : > { %v243_v44 = vsub.f32 %v232_v38, %v242_v42  ;;  %v246_v45 = vsub.f32 %v241_v39, %v242_v42 }
  0x26   : > { %v308_v46 = vsub.f32 %v297_v40, %v307_v43  ;;  %v311_v47 = vsub.f32 %v306_v41, %v307_v43 }
  0x27   : > { %v244_v48 = vmul.f32 1.442695, %v243_v44  ;;  %v247_v49 = vmul.f32 1.442695, %v246_v45 }
  0x28   : > { %v309_v50 = vmul.f32 1.442695, %v308_v46  ;;  %v312_v51 = vmul.f32 1.442695, %v311_v47 }
  0x29   : > { %477 = vpow2.f32 %v244_v48 }
  0x2a   : > { %479 = vpow2.f32 %v247_v49 }
  0x2b   : > { %481 = vpow2.f32 %v309_v50 }
  0x2c   : > { %483 = vpow2.f32 %v312_v51 }
  0x2f   : > { %v478_v52 = vpop.eup %477 }
  0x30   : > { %v480_v53 = vpop.eup %479 }
  0x31   : > { %v482_v54 = vpop.eup %481  ;;  %v249_v55 = vadd.f32 %v480_v53, %v478_v52 }
  0x32   : > { %v484_v56 = vpop.eup %483 }
  0x33   : > { %485 = vrcp.f32 %v249_v55  ;;  %v314_v57 = vadd.f32 %v484_v56, %v482_v54  ;;  %v261_v60 = vand.u32 2147483648, %v249_v55  ;;  %vm255_vm1 = vweird.f32 %v249_v55 }
  0x34   : > { %v259_v63 = vand.u32 2147483647, %v249_v55 }
  0x35   : > { %487 = vrcp.f32 %v314_v57  ;;  %v262_v2 = vor.u32 1.1754944e-38, %v261_v60  ;;  %v326_v3 = vand.u32 2147483648, %v314_v57  ;;  %vm320_vm4 = vweird.f32 %v314_v57 }
  0x36   : > { %v324_v6 = vand.u32 2147483647, %v314_v57  ;;  %vm260_vm6 = vcmp.eq.f32.partialorder %v259_v63, 8.507059e+37 }
  0x37   : > { %v327_v12 = vor.u32 1.1754944e-38, %v326_v3 }
  0x38   : > { %vm325_vm8 = vcmp.eq.f32.partialorder %v324_v6, 8.507059e+37 }
  0x39   : > { %v486_v58 = vpop.eup %485 }
  0x3a   : > { %v251_v59 = vmul.f32 %v486_v58, %v249_v55  ;;  %vm256_vm2 = vweird.f32 %v486_v58 }
  0x3b   : > { %v488_v61 = vpop.eup %487  ;;  %vm257_vm3 = vmor %vm255_vm1, %vm256_vm2 }
  0x3c   : > { %v252_v62 = vsub.f32 1.0, %v251_v59  ;;  %v316_v0 = vmul.f32 %v488_v61, %v314_v57  ;;  %vm321_vm5 = vweird.f32 %v488_v61 }
  0x3d   : > { %vm322_vm7 = vmor %vm320_vm4, %vm321_vm5 }
  0x3e   : > { %v253_v1 = vmul.f32 %v486_v58, %v252_v62  ;;  %v317_v5 = vsub.f32 1.0, %v316_v0 }
  0x40   : > { %v254_v7 = vadd.f32 %v486_v58, %v253_v1  ;;  %v318_v8 = vmul.f32 %v488_v61, %v317_v5 }
  0x42   : > { %v258_v11 = vsel %vm257_vm3, %v486_v58, %v254_v7  ;;  %v319_v14 = vadd.f32 %v488_v61, %v318_v8 }
  0x43   : > { %v263_v13 = vsel %vm260_vm6, %v262_v2, %v258_v11 }
  0x44   : > { %v265_v15 = vmul.f32 %v478_v52, %v263_v13  ;;  %v267_v16 = vmul.f32 %v480_v53, %v263_v13  ;;  %v323_v17 = vsel %vm322_vm7, %v488_v61, %v319_v14 }
  0x45   : > { %v328_v20 = vsel %vm325_vm8, %v327_v12, %v323_v17 }
  0x46   : > { %v266_v18 = vmul.f32 %v467_v9, %v265_v15  ;;  %v268_v19 = vmul.f32 %v468_v10, %v267_v16  ;;  %v330_v21 = vmul.f32 %v482_v54, %v328_v20  ;;  %v332_v22 = vmul.f32 %v484_v56, %v328_v20 }
  0x48   : > { %v269_v23 = vadd.f32 %v268_v19, %v266_v18  ;;  %v331_v24 = vmul.f32 %v467_v9, %v330_v21  ;;  %v333_v25 = vmul.f32 %v468_v10, %v332_v22 }
  0x4a   : > { %v270_v26 = vsel %vm224_vm0, %v269_v23, 0.0  ;;  %v334_v27 = vadd.f32 %v333_v25, %v331_v24 }
  0x4b   : > { %271 = vadd.xlane.f32.xlu0 %v270_v26 }
  0x4c   : > { %v335_v28 = vsel %vm224_vm0, %v334_v27, 0.0 }
  0x53   : > { %336 = vadd.xlane.f32.xlu0 %v335_v28 }
  0xbe   : > { %v272_v29 = vpop.xlane.xlu0 %271 }
  0xbf   : > { %489 = vrcp.f32 %v272_v29  ;;  %v284_v34 = vand.u32 2147483648, %v272_v29  ;;  %v282_v36 = vand.u32 2147483647, %v272_v29  ;;  %vm278_vm10 = vweird.f32 %v272_v29 }
  0xc1   : > { %v285_v39 = vor.u32 1.1754944e-38, %v284_v34  ;;  %vm283_vm12 = vcmp.eq.f32.partialorder %v282_v36, 8.507059e+37 }
  0xc5   : > { %v490_v30 = vpop.eup %489 }
  0xc6   : > { %v274_v31 = vmul.f32 %v490_v30, %v272_v29  ;;  %v337_v32 = vpop.xlane.xlu0 %336  ;;  %vm279_vm9 = vweird.f32 %v490_v30 }
  0xc7   : > { %491 = vrcp.f32 %v337_v32  ;;  %vm280_vm11 = vmor %vm278_vm10, %vm279_vm9  ;;  %v349_v45 = vand.u32 2147483648, %v337_v32  ;;  %v347_v48 = vand.u32 2147483647, %v337_v32  ;;  %vm343_vm15 = vweird.f32 %v337_v32 }
  0xc8   : > { %v275_v33 = vsub.f32 1.0, %v274_v31 }
  0xc9   : > { %v350_v51 = vor.u32 1.1754944e-38, %v349_v45  ;;  %vm348_vm1 = vcmp.eq.f32.partialorder %v347_v48, 8.507059e+37 }
  0xca   : > { %v276_v35 = vmul.f32 %v490_v30, %v275_v33 }
  0xcc   : > { %v277_v37 = vadd.f32 %v490_v30, %v276_v35 }
  0xcd   : > { %v492_v38 = vpop.eup %491 }
  0xce   : > { %v281_v40 = vsel %vm280_vm11, %v490_v30, %v277_v37  ;;  %v339_v41 = vmul.f32 %v492_v38, %v337_v32  ;;  %vm344_vm13 = vweird.f32 %v492_v38 }
  0xcf   : > { %v286_v42 = vsel %vm283_vm12, %v285_v39, %v281_v40  ;;  %vm345_vm0 = vmor %vm343_vm15, %vm344_vm13 }
  0xd0   : > { %v287_v43 = vmul.f32 0.5, %v286_v42  ;;  %v340_v44 = vsub.f32 1.0, %v339_v41 }
  0xd2   : > { %v288_v46 = vmul.f32 %v287_v43, %v269_v23  ;;  %v341_v47 = vmul.f32 %v492_v38, %v340_v44 }
  0xd4   : > { %v354_v49 = vpack.c.bf16 %v288_v46, %v288_v46  ;;  %v342_v50 = vadd.f32 %v492_v38, %v341_v47 }
  0xd6   : > { %357 = vst.msk [vmem:[%s210_s26] sm:$0xf] %vm356_vm14, %v354_v49  ;;  %v346_v52 = vsel %vm345_vm0, %v492_v38, %v342_v50 }
  0xd7   : > { %v351_v53 = vsel %vm348_vm1, %v350_v51, %v346_v52 }
  0xd8   : > { %v352_v54 = vmul.f32 0.5, %v351_v53 }
  0xda   : > { %v353_v55 = vmul.f32 %v352_v54, %v334_v27 }
  0xdc   : > { %v355_v56 = vpack.c.bf16 %v353_v55, %v353_v55 }
  0xde   : > { %358 = vst.msk [vmem:[%s210_s26 + $0x4] sm:$0xf] %vm356_vm14, %v355_v56 }
  0xdf PF: > { %s13_s12 = sadd.s32 1, %s499_s12  }
  0xe0   : > { %p10_p4 = scmp.ge.s32.totalorder %s13_s12, 4  }
  0xe2   :  { %12 = sbr.rel (!%p10_p4) target bundleno = 1 (0x1), region = 68 }

// kernel: dilated_transformer_decoder_layer.13
= control target key start
LH: loop header
LB: loop body
LE: loop exit
PB: predicated region body
PF: predicated region fallthrough
CT: control target
= control target key end

     0   :  { %s521_s12 = smov 0   ;;  %s556_s0 = inlined_call_operand.vmem [shape: bf16[2,2,8,8], index: 0, kind: input, shape index: {}]   ;;  %s557_s1 = inlined_call_operand.vmem [shape: bf16[2,2,8,8], index: 1, kind: input, shape index: {}]   ;;  %s558_s2 = inlined_call_operand.vmem [shape: bf16[2,2,8,8], index: 2, kind: input, shape index: {}]   ;;  %s559_s3 = inlined_call_operand.vmem [shape: bf16[2,2,8,8], index: 3, kind: output, shape index: {}]  }
   0x1 LB: > { %s438_s13 = sadd.s32 4294967295, %s499_s12   ;;  %p442_p0 = scmp.ge.s32.totalorder %s499_s12, 1  ;;  %s499_s12 = sphi %s521_s12, %s13_s12  }
   0x2   : > { %p157_p1 = scmp.lt.s32.totalorder %s499_s12, 3 }
   0x4   : > { %p158_p2 = pnand %p442_p0, %p157_p1 }
   0x5   : > { %p191_p3 = scmp.lt.s32.totalorder (!%p158_p2), %s438_s13, 1 }
   0x6   : > { %161 = sbr.rel (%p158_p2) target bundleno = 223 (0xdf), region = 32 }
   0xb   : > { %s561_s13 = smov (!%p191_p3, %s438_s13), 1  ;;  %vm224_vm0 = vcmask 64512   ;;  %vm356_vm14 = vcmask 60416  }
   0xc   : > { %s529_s14 = sshll.u32 %s561_s13, 3 }
   0xd   : > { %s195_s17 = scalar_lea.vmem %s556_s0, %s529_s14  ;;  %s200_s20 = scalar_lea.vmem %s557_s1, %s529_s14 }
   0xe   : > { %v458_v0 = vld [vmem:[%s195_s17] sm:$0xff]   ;;  %s205_s23 = scalar_lea.vmem %s558_s2, %s529_s14  ;;  %s210_s26 = scalar_lea.vmem %s559_s3, %s529_s14 }
   0xf   : > { %v462_v1 = vld [vmem:[%s200_s20] sm:$0xff]   ;;  %v459_v2 = vunpack.c.l.bf16 %v458_v0  ;;  %v460_v3 = vunpack.c.h.bf16 %v458_v0 }
  0x10   : > { %v463_v4 = vunpack.c.l.bf16 %v462_v1  ;;  %v464_v5 = vunpack.c.h.bf16 %v462_v1 }
  0x12   : > { %v223_v6 = vmul.f32 %v463_v4, %v459_v2  ;;  %v233_v7 = vmul.f32 %v464_v5, %v459_v2  ;;  %v289_v8 = vmul.f32 %v463_v4, %v460_v3  ;;  %v298_v9 = vmul.f32 %v464_v5, %v460_v3  ;;  %v466_v4 = vld [vmem:[%s205_s23] sm:$0xff]  }
  0x14   : > { %v225_v10 = vsel %vm224_vm0, %v223_v6, 0.0  ;;  %v234_v11 = vsel %vm224_vm0, %v233_v7, 0.0  ;;  %v290_v12 = vsel %vm224_vm0, %v289_v8, 0.0  ;;  %v299_v13 = vsel %vm224_vm0, %v298_v9, 0.0 }
  0x15   : > { %v226_v14 = vrot.slane %v225_v10, 4  ;;  %v235_v15 = vrot.slane %v234_v11, 4  ;;  %v291_v16 = vrot.slane %v290_v12, 4  ;;  %v300_v17 = vrot.slane %v299_v13, 4 }
  0x16   : > { %v467_v9 = vunpack.c.l.bf16 %v466_v4 }
  0x17   : > { %v227_v18 = vadd.f32 %v226_v14, %v225_v10  ;;  %v236_v19 = vadd.f32 %v235_v15, %v234_v11  ;;  %v292_v20 = vadd.f32 %v291_v16, %v290_v12  ;;  %v301_v21 = vadd.f32 %v300_v17, %v299_v13 }
  0x18   : > { %v468_v10 = vunpack.c.h.bf16 %v466_v4 }
  0x19   : > { %v228_v22 = vrot.slane %v227_v18, 2  ;;  %v237_v23 = vrot.slane %v236_v19, 2  ;;  %v293_v24 = vrot.slane %v292_v20, 2  ;;  %v302_v25 = vrot.slane %v301_v21, 2 }
  0x1b   : > { %v229_v26 = vadd.f32 %v228_v22, %v227_v18  ;;  %v238_v27 = vadd.f32 %v237_v23, %v236_v19  ;;  %v294_v28 = vadd.f32 %v293_v24, %v292_v20  ;;  %v303_v29 = vadd.f32 %v302_v25, %v301_v21 }
  0x1d   : > { %v230_v30 = vrot.slane %v229_v26, 1  ;;  %v239_v31 = vrot.slane %v238_v27, 1  ;;  %v295_v32 = vrot.slane %v294_v28, 1  ;;  %v304_v33 = vrot.slane %v303_v29, 1 }
  0x1f   : > { %v231_v34 = vadd.f32 %v230_v30, %v229_v26  ;;  %v240_v35 = vadd.f32 %v239_v31, %v238_v27  ;;  %v296_v36 = vadd.f32 %v295_v32, %v294_v28  ;;  %v305_v37 = vadd.f32 %v304_v33, %v303_v29 }
  0x21   : > { %v232_v38 = vmul.f32 0.35355338, %v231_v34  ;;  %v241_v39 = vmul.f32 0.35355338, %v240_v35  ;;  %v297_v40 = vmul.f32 0.35355338, %v296_v36 }
  0x22   : > { %v306_v41 = vmul.f32 0.35355338, %v305_v37 }
  0x23   : > { %v242_v42 = vmax.f32 %v232_v38, %v241_v39 }
  0x24   : > { %v307_v43 = vmax.f32 %v297_v40, %v306_v41 }
  0x25   : > { %v243_v44 = vsub.f32 %v232_v38, %v242_v42  ;;  %v246_v45 = vsub.f32 %v241_v39, %v242_v42 }
  0x26   : > { %v308_v46 = vsub.f32 %v297_v40, %v307_v43  ;;  %v311_v47 = vsub.f32 %v306_v41, %v307_v43 }
  0x27   : > { %v244_v48 = vmul.f32 1.442695, %v243_v44  ;;  %v247_v49 = vmul.f32 1.442695, %v246_v45 }
  0x28   : > { %v309_v50 = vmul.f32 1.442695, %v308_v46  ;;  %v312_v51 = vmul.f32 1.442695, %v311_v47 }
  0x29   : > { %477 = vpow2.f32 %v244_v48 }
  0x2a   : > { %479 = vpow2.f32 %v247_v49 }
  0x2b   : > { %481 = vpow2.f32 %v309_v50 }
  0x2c   : > { %483 = vpow2.f32 %v312_v51 }
  0x2f   : > { %v478_v52 = vpop.eup %477 }
  0x30   : > { %v480_v53 = vpop.eup %479 }
  0x31   : > { %v482_v54 = vpop.eup %481  ;;  %v249_v55 = vadd.f32 %v480_v53, %v478_v52 }
  0x32   : > { %v484_v56 = vpop.eup %483 }
  0x33   : > { %485 = vrcp.f32 %v249_v55  ;;  %v314_v57 = vadd.f32 %v484_v56, %v482_v54  ;;  %v261_v60 = vand.u32 2147483648, %v249_v55  ;;  %vm255_vm1 = vweird.f32 %v249_v55 }
  0x34   : > { %v259_v63 = vand.u32 2147483647, %v249_v55 }
  0x35   : > { %487 = vrcp.f32 %v314_v57  ;;  %v262_v2 = vor.u32 1.1754944e-38, %v261_v60  ;;  %v326_v3 = vand.u32 2147483648, %v314_v57  ;;  %vm320_vm4 = vweird.f32 %v314_v57 }
  0x36   : > { %v324_v6 = vand.u32 2147483647, %v314_v57  ;;  %vm260_vm6 = vcmp.eq.f32.partialorder %v259_v63, 8.507059e+37 }
  0x37   : > { %v327_v12 = vor.u32 1.1754944e-38, %v326_v3 }
  0x38   : > { %vm325_vm8 = vcmp.eq.f32.partialorder %v324_v6, 8.507059e+37 }
  0x39   : > { %v486_v58 = vpop.eup %485 }
  0x3a   : > { %v251_v59 = vmul.f32 %v486_v58, %v249_v55  ;;  %vm256_vm2 = vweird.f32 %v486_v58 }
  0x3b   : > { %v488_v61 = vpop.eup %487  ;;  %vm257_vm3 = vmor %vm255_vm1, %vm256_vm2 }
  0x3c   : > { %v252_v62 = vsub.f32 1.0, %v251_v59  ;;  %v316_v0 = vmul.f32 %v488_v61, %v314_v57  ;;  %vm321_vm5 = vweird.f32 %v488_v61 }
  0x3d   : > { %vm322_vm7 = vmor %vm320_vm4, %vm321_vm5 }
  0x3e   : > { %v253_v1 = vmul.f32 %v486_v58, %v252_v62  ;;  %v317_v5 = vsub.f32 1.0, %v316_v0 }
  0x40   : > { %v254_v7 = vadd.f32 %v486_v58, %v253_v1  ;;  %v318_v8 = vmul.f32 %v488_v61, %v317_v5 }
  0x42   : > { %v258_v11 = vsel %vm257_vm3, %v486_v58, %v254_v7  ;;  %v319_v14 = vadd.f32 %v488_v61, %v318_v8 }
  0x43   : > { %v263_v13 = vsel %vm260_vm6, %v262_v2, %v258_v11 }
  0x44   : > { %v265_v15 = vmul.f32 %v478_v52, %v263_v13  ;;  %v267_v16 = vmul.f32 %v480_v53, %v263_v13  ;;  %v323_v17 = vsel %vm322_vm7, %v488_v61, %v319_v14 }
  0x45   : > { %v328_v20 = vsel %vm325_vm8, %v327_v12, %v323_v17 }
  0x46   : > { %v266_v18 = vmul.f32 %v467_v9, %v265_v15  ;;  %v268_v19 = vmul.f32 %v468_v10, %v267_v16  ;;  %v330_v21 = vmul.f32 %v482_v54, %v328_v20  ;;  %v332_v22 = vmul.f32 %v484_v56, %v328_v20 }
  0x48   : > { %v269_v23 = vadd.f32 %v268_v19, %v266_v18  ;;  %v331_v24 = vmul.f32 %v467_v9, %v330_v21  ;;  %v333_v25 = vmul.f32 %v468_v10, %v332_v22 }
  0x4a   : > { %v270_v26 = vsel %vm224_vm0, %v269_v23, 0.0  ;;  %v334_v27 = vadd.f32 %v333_v25, %v331_v24 }
  0x4b   : > { %271 = vadd.xlane.f32.xlu0 %v270_v26 }
  0x4c   : > { %v335_v28 = vsel %vm224_vm0, %v334_v27, 0.0 }
  0x53   : > { %336 = vadd.xlane.f32.xlu0 %v335_v28 }
  0xbe   : > { %v272_v29 = vpop.xlane.xlu0 %271 }
  0xbf   : > { %489 = vrcp.f32 %v272_v29  ;;  %v284_v34 = vand.u32 2147483648, %v272_v29  ;;  %v282_v36 = vand.u32 2147483647, %v272_v29  ;;  %vm278_vm10 = vweird.f32 %v272_v29 }
  0xc1   : > { %v285_v39 = vor.u32 1.1754944e-38, %v284_v34  ;;  %vm283_vm12 = vcmp.eq.f32.partialorder %v282_v36, 8.507059e+37 }
  0xc5   : > { %v490_v30 = vpop.eup %489 }
  0xc6   : > { %v274_v31 = vmul.f32 %v490_v30, %v272_v29  ;;  %v337_v32 = vpop.xlane.xlu0 %336  ;;  %vm279_vm9 = vweird.f32 %v490_v30 }
  0xc7   : > { %491 = vrcp.f32 %v337_v32  ;;  %vm280_vm11 = vmor %vm278_vm10, %vm279_vm9  ;;  %v349_v45 = vand.u32 2147483648, %v337_v32  ;;  %v347_v48 = vand.u32 2147483647, %v337_v32  ;;  %vm343_vm15 = vweird.f32 %v337_v32 }
  0xc8   : > { %v275_v33 = vsub.f32 1.0, %v274_v31 }
  0xc9   : > { %v350_v51 = vor.u32 1.1754944e-38, %v349_v45  ;;  %vm348_vm1 = vcmp.eq.f32.partialorder %v347_v48, 8.507059e+37 }
  0xca   : > { %v276_v35 = vmul.f32 %v490_v30, %v275_v33 }
  0xcc   : > { %v277_v37 = vadd.f32 %v490_v30, %v276_v35 }
  0xcd   : > { %v492_v38 = vpop.eup %491 }
  0xce   : > { %v281_v40 = vsel %vm280_vm11, %v490_v30, %v277_v37  ;;  %v339_v41 = vmul.f32 %v492_v38, %v337_v32  ;;  %vm344_vm13 = vweird.f32 %v492_v38 }
  0xcf   : > { %v286_v42 = vsel %vm283_vm12, %v285_v39, %v281_v40  ;;  %vm345_vm0 = vmor %vm343_vm15, %vm344_vm13 }
  0xd0   : > { %v287_v43 = vmul.f32 0.5, %v286_v42  ;;  %v340_v44 = vsub.f32 1.0, %v339_v41 }
  0xd2   : > { %v288_v46 = vmul.f32 %v287_v43, %v269_v23  ;;  %v341_v47 = vmul.f32 %v492_v38, %v340_v44 }
  0xd4   : > { %v354_v49 = vpack.c.bf16 %v288_v46, %v288_v46  ;;  %v342_v50 = vadd.f32 %v492_v38, %v341_v47 }
  0xd6   : > { %357 = vst.msk [vmem:[%s210_s26] sm:$0xf] %vm356_vm14, %v354_v49  ;;  %v346_v52 = vsel %vm345_vm0, %v492_v38, %v342_v50 }
  0xd7   : > { %v351_v53 = vsel %vm348_vm1, %v350_v51, %v346_v52 }
  0xd8   : > { %v352_v54 = vmul.f32 0.5, %v351_v53 }
  0xda   : > { %v353_v55 = vmul.f32 %v352_v54, %v334_v27 }
  0xdc   : > { %v355_v56 = vpack.c.bf16 %v353_v55, %v353_v55 }
  0xde   : > { %358 = vst.msk [vmem:[%s210_s26 + $0x4] sm:$0xf] %vm356_vm14, %v355_v56 }
  0xdf PF: > { %s13_s12 = sadd.s32 1, %s499_s12  }
  0xe0   : > { %p10_p4 = scmp.ge.s32.totalorder %s13_s12, 4  }
  0xe2   :  { %12 = sbr.rel (!%p10_p4) target bundleno = 1 (0x1), region = 68 }

// kernel: dilated_transformer_decoder_layer.15
= control target key start
LH: loop header
LB: loop body
LE: loop exit
PB: predicated region body
PF: predicated region fallthrough
CT: control target
= control target key end

     0   :  { %vm25_vm0 = vcmask 261120   ;;  %v225_v8 = vmov 32.0   ;;  %vm188_vm14 = vcmask 257024   ;;  %s325_s0 = inlined_call_operand.vmem [shape: f32[32,32], index: 0, kind: input, shape index: {}]   ;;  %s326_s1 = inlined_call_operand.vmem [shape: f32[1,32], index: 1, kind: input, shape index: {}]   ;;  %s327_s2 = inlined_call_operand.vmem [shape: f32[1,32], index: 2, kind: input, shape index: {}]   ;;  %s328_s4 = inlined_call_operand.vmem [shape: f32[1,32], index: 4, kind: input, shape index: {}]   ;;  %s329_s3 = inlined_call_operand.vmem [shape: bf16[32,32], index: 3, kind: input, shape index: {}]   ;;  %s330_s5 = inlined_call_operand.vmem [shape: bf16[32,32], index: 5, kind: output, shape index: {}]  }
   0x1   :  { %v23_v0 = vld [vmem:[%s325_s0 + $0x10] sm:$0xff]  ;;  %v21_v1 = vld [vmem:[%s325_s0] sm:$0xff]  ;;  %v24_v4 = vld [vmem:[%s325_s0 + $0x18] sm:$0xff]  ;;  %215 = vrcp.f32 %v225_v8 }
   0x2   :  { %v32_v2 = vsel %vm25_vm0, %v23_v0, 0.0  ;;  %v26_v3 = vsel %vm25_vm0, %v21_v1, 0.0  ;;  %v22_v5 = vld [vmem:[%s325_s0 + $0x8] sm:$0xff]  ;;  %v35_v6 = vsel %vm25_vm0, %v24_v4, 0.0  ;;  %v207_v40 = vld [vmem:[%s329_s3] sm:$0xff] }
   0x3   :  { %33 = vadd.xlane.f32.xlu1 %v32_v2  ;;  %27 = vadd.xlane.f32.xlu0 %v26_v3  ;;  %v29_v7 = vsel %vm25_vm0, %v22_v5, 0.0  ;;  %v208_v35 = vld [vmem:[%s329_s3 + $0x8] sm:$0xff] }
   0x4   :  { %171 = vmatpush.bf16.msra.mxu0 %v208_v35  ;;  %209 = vmatpush.bf16.msra.mxu1 %v208_v35 }
   0x7   :  { %v216_v9 = vpop.eup %215 }
   0x8   :  { %v39_v10 = vmul.f32 32.0, %v216_v9  ;;  %vm43_vm1 = vweird.f32 %v216_v9  ;;  %172 = vmatpush.bf16.msra.mxu0 %v207_v40  ;;  %210 = vmatpush.bf16.msra.mxu1 %v207_v40 }
   0xa   :  { %v40_v11 = vsub.f32 1.0, %v39_v10  ;;  %v212_v10 = vld [vmem:[%s326_s1] ss:$0 sm:$0xff] }
   0xb   :  { %36 = vadd.xlane.f32.xlu1 %v35_v6  ;;  %30 = vadd.xlane.f32.xlu0 %v29_v7 }
   0xc   :  { %v41_v12 = vmul.f32 %v216_v9, %v40_v11 }
   0xe   :  { %v42_v13 = vadd.f32 %v216_v9, %v41_v12 }
  0x10   :  { %v44_v14 = vsel %vm43_vm1, %v216_v9, %v42_v13 }
  0x76   :  { %v34_v15 = vpop.xlane.xlu1 %33  ;;  %v28_v16 = vpop.xlane.xlu0 %27 }
  0x77   :  { %v47_v17 = vmul.f32 %v44_v14, %v34_v15  ;;  %v45_v18 = vmul.f32 %v44_v14, %v28_v16 }
  0x79   :  { %v272_v19 = vsub.f32 %v23_v0, %v47_v17  ;;  %v274_v20 = vsub.f32 %v21_v1, %v45_v18  ;;  %v213_v17 = vld [vmem:[%s327_s2] ss:$0 sm:$0xff] }
  0x7b   :  { %v55_v21 = vmul.f32 %v272_v19, %v272_v19  ;;  %v53_v22 = vmul.f32 %v274_v20, %v274_v20 }
  0x7d   :  { %v63_v23 = vsel %vm25_vm0, %v55_v21, 0.0  ;;  %v57_v24 = vsel %vm25_vm0, %v53_v22, 0.0 }
  0x7e   :  { %v37_v25 = vpop.xlane.xlu1 %36  ;;  %64 = vadd.xlane.f32.xlu0 %v63_v23  ;;  %58 = vadd.xlane.f32.xlu2 %v57_v24  ;;  %v31_v26 = vpop.xlane.xlu0 %30 }
  0x7f   :  { %v48_v27 = vmul.f32 %v44_v14, %v37_v25  ;;  %v46_v28 = vmul.f32 %v44_v14, %v31_v26 }
  0x81   :  { %v282_v29 = vsub.f32 %v24_v4, %v48_v27  ;;  %v284_v30 = vsub.f32 %v22_v5, %v46_v28 }
  0x83   :  { %v56_v31 = vmul.f32 %v282_v29, %v282_v29  ;;  %v54_v32 = vmul.f32 %v284_v30, %v284_v30 }
  0x85   :  { %v66_v33 = vsel %vm25_vm0, %v56_v31, 0.0  ;;  %v60_v34 = vsel %vm25_vm0, %v54_v32, 0.0 }
  0x86   :  { %67 = vadd.xlane.f32.xlu1 %v66_v33  ;;  %61 = vadd.xlane.f32.xlu2 %v60_v34 }
  0xf1   :  { %v59_v36 = vpop.xlane.xlu2 %58  ;;  %v65_v37 = vpop.xlane.xlu0 %64 }
  0xf2   :  { %v69_v38 = vmul.f32 %v59_v36, %v44_v14  ;;  %v71_v39 = vmul.f32 %v65_v37, %v44_v14 }
  0xf4   :  { %v73_v41 = vadd.f32 1e-05, %v69_v38  ;;  %v75_v42 = vadd.f32 1e-05, %v71_v39 }
  0xf6   :  { %217 = vrsqrt.f32 %v73_v41  ;;  %vm103_vm4 = vweird.f32 %v75_v42  ;;  %vm83_vm5 = vweird.f32 %v73_v41 }
  0xf7   :  { %219 = vrsqrt.f32 %v75_v42 }
  0xf9   :  { %v68_v43 = vpop.xlane.xlu1 %67  ;;  %v62_v44 = vpop.xlane.xlu2 %61 }
  0xfa   :  { %v72_v45 = vmul.f32 %v68_v43, %v44_v14  ;;  %v70_v46 = vmul.f32 %v62_v44, %v44_v14 }
  0xfc   :  { %v218_v47 = vpop.eup %217  ;;  %v76_v48 = vadd.f32 1e-05, %v72_v45  ;;  %v74_v49 = vadd.f32 1e-05, %v70_v46 }
  0xfd   :  { %v220_v50 = vpop.eup %219  ;;  %v78_v51 = vmul.f32 %v218_v47, %v73_v41  ;;  %vm84_vm3 = vweird.f32 %v218_v47 }
  0xfe   :  { %v98_v52 = vmul.f32 %v220_v50, %v75_v42  ;;  %221 = vrsqrt.f32 %v76_v48  ;;  %vm104_vm2 = vweird.f32 %v220_v50  ;;  %vm85_vm7 = vmor %vm83_vm5, %vm84_vm3  ;;  %vm113_vm10 = vweird.f32 %v76_v48 }
  0xff   :  { %v79_v53 = vmul.f32 %v218_v47, %v78_v51  ;;  %223 = vrsqrt.f32 %v74_v49  ;;  %vm105_vm6 = vmor %vm103_vm4, %vm104_vm2  ;;  %vm93_vm12 = vweird.f32 %v74_v49 }
 0x100   :  { %v99_v54 = vmul.f32 %v220_v50, %v98_v52 }
 0x101   :  { %v80_v55 = vmul.f32 0.5, %v79_v53 }
 0x102   :  { %v100_v56 = vmul.f32 0.5, %v99_v54 }
 0x103   :  { %v81_v57 = vsub.f32 1.5, %v80_v55 }
 0x104   :  { %v222_v58 = vpop.eup %221  ;;  %v101_v59 = vsub.f32 1.5, %v100_v56 }
 0x105   :  { %v224_v60 = vpop.eup %223  ;;  %v108_v61 = vmul.f32 %v222_v58, %v76_v48  ;;  %v82_v62 = vmul.f32 %v218_v47, %v81_v57  ;;  %vm114_vm8 = vweird.f32 %v222_v58 }
 0x106   :  { %v102_v63 = vmul.f32 %v220_v50, %v101_v59  ;;  %v88_v0 = vmul.f32 %v224_v60, %v74_v49  ;;  %vm94_vm9 = vweird.f32 %v224_v60  ;;  %vm115_vm11 = vmor %vm113_vm10, %vm114_vm8 }
 0x107   :  { %v109_v1 = vmul.f32 %v222_v58, %v108_v61  ;;  %v86_v5 = vsel %vm85_vm7, %v218_v47, %v82_v62  ;;  %vm95_vm13 = vmor %vm93_vm12, %vm94_vm9 }
 0x108   :  { %v89_v2 = vmul.f32 %v224_v60, %v88_v0  ;;  %v106_v3 = vsel %vm105_vm6, %v220_v50, %v102_v63  ;;  %v117_v11 = vmul.f32 %v86_v5, %v274_v20 }
 0x109   :  { %v110_v4 = vmul.f32 0.5, %v109_v1  ;;  %v119_v8 = vmul.f32 %v106_v3, %v272_v19 }
 0x10a   :  { %v90_v6 = vmul.f32 0.5, %v89_v2  ;;  %v125_v21 = vmul.f32 %v212_v10, %v117_v11 }
 0x10b   :  { %v111_v7 = vsub.f32 1.5, %v110_v4  ;;  %v127_v18 = vmul.f32 %v212_v10, %v119_v8 }
 0x10c   :  { %v91_v9 = vsub.f32 1.5, %v90_v6  ;;  %v133_v25 = vadd.f32 %v213_v17, %v125_v21 }
 0x10d   :  { %v112_v12 = vmul.f32 %v222_v58, %v111_v7  ;;  %v135_v23 = vadd.f32 %v213_v17, %v127_v18 }
 0x10e   :  { %v92_v13 = vmul.f32 %v224_v60, %v91_v9 }
 0x10f   :  { %v116_v14 = vsel %vm115_vm11, %v222_v58, %v112_v12 }
 0x110   :  { %v120_v15 = vmul.f32 %v116_v14, %v282_v29  ;;  %v96_v16 = vsel %vm95_vm13, %v224_v60, %v92_v13  ;;  %v214_v29 = vld [vmem:[%s328_s4] ss:$0 sm:$0xff] }
 0x111   :  { %v118_v19 = vmul.f32 %v96_v16, %v284_v30 }
 0x112   :  { %v128_v22 = vmul.f32 %v212_v10, %v120_v15 }
 0x113   :  { %v126_v20 = vmul.f32 %v212_v10, %v118_v19 }
 0x114   :  { %v136_v24 = vadd.f32 %v213_v17, %v128_v22 }
 0x115   :  { %v134_v26 = vadd.f32 %v213_v17, %v126_v20 }
 0x116   :  { %v138_v27 = vpack.c.bf16 %v136_v24, %v135_v23 }
 0x117   :  { %v137_v28 = vpack.c.bf16 %v134_v26, %v133_v25 }
 0x118   :  { %206 = vmatmul.msk.bf16.vlgmr.msra.gmra.mxu1 %vm25_vm0, %v138_v27 }
 0x119   :  { %205 = vmatmul.msk.bf16.vlgmr.msra.gmra.mxu0 %vm25_vm0, %v137_v28 }
 0x195   :  { %v179_v31 = vpop.f32.mrf.mxu1 }
 0x196   :  { %v174_v32 = vpop.f32.mrf.mxu0  ;;  %v180_v30 = vadd.f32 %v214_v29, %v179_v31 }
 0x197   :  { %v175_v33 = vadd.f32 %v214_v29, %v174_v32 }
 0x198   :  { %v186_v34 = vpack.c.bf16 %v180_v30, %v180_v30 }
 0x199   :  { %v184_v35 = vpack.c.bf16 %v175_v33, %v175_v33 }
 0x19a   :  { %191 = vst.msk [vmem:[%s330_s5 + $0x8] sm:$0xf] %vm188_vm14, %v186_v34 }
 0x19b   :  { %189 = vst.msk [vmem:[%s330_s5] sm:$0xf] %vm188_vm14, %v184_v35 }
 0x19d   :  { %v181_v36 = vpop.f32.mrf.mxu1 }
 0x19e   :  { %v176_v37 = vpop.f32.mrf.mxu0  ;;  %v182_v38 = vadd.f32 %v214_v29, %v181_v36 }
 0x19f   :  { %v177_v39 = vadd.f32 %v214_v29, %v176_v37 }
 0x1a0   :  { %v187_v40 = vpack.c.bf16 %v182_v38, %v182_v38 }
 0x1a1   :  { %v185_v41 = vpack.c.bf16 %v177_v39, %v177_v39 }
 0x1a2   :  { %192 = vst.msk [vmem:[%s330_s5 + $0xc] sm:$0xf] %vm188_vm14, %v187_v40 }
 0x1a3   :  { %190 = vst.msk [vmem:[%s330_s5 + $0x4] sm:$0xf] %vm188_vm14, %v185_v41 }

// kernel: dilated_transformer_decoder_layer.14
= control target key start
LH: loop header
LB: loop body
LE: loop exit
PB: predicated region body
PF: predicated region fallthrough
CT: control target
= control target key end

     0   :  { %vm52_vm0 = vcmask 261120   ;;  %s189_s1 = inlined_call_operand.vmem [shape: bf16[32,32], index: 1, kind: input, shape index: {}]   ;;  %s190_s2 = inlined_call_operand.vmem [shape: f32[1,32], index: 2, kind: input, shape index: {}]   ;;  %s191_s0 = inlined_call_operand.vmem [shape: bf16[32,32], index: 0, kind: input, shape index: {}]   ;;  %s192_s3 = inlined_call_operand.vmem [shape: f32[32,32], index: 3, kind: input, shape index: {}, may-alias: {3,4}]   ;;  %s193_s4 = inlined_call_operand.vmem [shape: f32[32,32], index: 4, kind: output, shape index: {}, may-alias: {3,4}]  }
   0x1   :  { %v115_v0 = vld [vmem:[%s189_s1 + $0x8] sm:$0xff]  ;;  %v114_v1 = vld [vmem:[%s189_s1] sm:$0xff]  ;;  %v80_v8 = vld [vmem:[%s192_s3 + $0x10] sm:$0xff] }
   0x2   :  { %65 = vmatpush.bf16.msra.mxu0 %v115_v0  ;;  %116 = vmatpush.bf16.msra.mxu1 %v115_v0  ;;  %v112_v2 = vld [vmem:[%s191_s0] sm:$0xff]  ;;  %v113_v3 = vld [vmem:[%s191_s0 + $0x8] sm:$0xff] }
   0x3   :  { %v118_v4 = vld [vmem:[%s190_s2] ss:$0 sm:$0xff] }
   0x4   :  { %v78_v6 = vld [vmem:[%s192_s3] sm:$0xff] }
   0x6   :  { %66 = vmatpush.bf16.msra.mxu0 %v114_v1  ;;  %117 = vmatpush.bf16.msra.mxu1 %v114_v1 }
   0x9   :  { %110 = vmatmul.msk.bf16.vlgmr.msra.gmra.mxu0 %vm52_vm0, %v112_v2  ;;  %111 = vmatmul.msk.bf16.vlgmr.msra.gmra.mxu1 %vm52_vm0, %v113_v3 }
  0x86   :  { %v68_v5 = vpop.f32.mrf.mxu0  ;;  %v73_v7 = vpop.f32.mrf.mxu1 }
  0x87   :  { %v69_v9 = vadd.f32 %v118_v4, %v68_v5  ;;  %v74_v10 = vadd.f32 %v118_v4, %v73_v7 }
  0x89   :  { %v82_v11 = vadd.f32 %v78_v6, %v69_v9  ;;  %v84_v12 = vadd.f32 %v80_v8, %v74_v10 }
  0x8b   :  { %86 = vst.msk [vmem:[%s193_s4] sm:$0xff] %vm52_vm0, %v82_v11 }
  0x8c   :  { %88 = vst.msk [vmem:[%s193_s4 + $0x10] sm:$0xff] %vm52_vm0, %v84_v12 }
  0x8e   :  { %v70_v13 = vpop.f32.mrf.mxu0  ;;  %v75_v15 = vpop.f32.mrf.mxu1 }
  0x8f   :  { %v71_v17 = vadd.f32 %v118_v4, %v70_v13  ;;  %v76_v18 = vadd.f32 %v118_v4, %v75_v15 }
  0x93   :  { %v79_v14 = vld [vmem:[%s192_s3 + $0x8] sm:$0xff]  ;;  %v81_v16 = vld [vmem:[%s192_s3 + $0x18] sm:$0xff] }
  0x94   :  { %v83_v19 = vadd.f32 %v79_v14, %v71_v17  ;;  %v85_v20 = vadd.f32 %v81_v16, %v76_v18 }
  0x96   :  { %87 = vst.msk [vmem:[%s193_s4 + $0x8] sm:$0xff] %vm52_vm0, %v83_v19 }
  0x97   :  { %89 = vst.msk [vmem:[%s193_s4 + $0x18] sm:$0xff] %vm52_vm0, %v85_v20 }

// kernel: dilated_transformer_decoder_layer.16
= control target key start
LH: loop header
LB: loop body
LE: loop exit
PB: predicated region body
PF: predicated region fallthrough
CT: control target
= control target key end

     0   :  { %vm41_vm0 = vcmask 261120   ;;  %vm71_vm1 = vcmask 519168   ;;  %s148_s1 = inlined_call_operand.vmem [shape: bf16[32,64], index: 1, kind: input, shape index: {}]   ;;  %s149_s0 = inlined_call_operand.vmem [shape: f32[32,32], index: 0, kind: input, shape index: {}]   ;;  %s150_s2 = inlined_call_operand.vmem [shape: f32[1,64], index: 2, kind: input, shape index: {}]   ;;  %s151_s3 = inlined_call_operand.vmem [shape: bf16[32,64], index: 3, kind: output, shape index: {}]  }
   0x1   :  { %v91_v0 = vld [vmem:[%s148_s1 + $0x8] sm:$0xff]  ;;  %v90_v1 = vld [vmem:[%s148_s1] sm:$0xff]  ;;  %v17_v4 = vld [vmem:[%s149_s0 + $0x10] sm:$0xff] }
   0x2   :  { %v15_v2 = vld [vmem:[%s149_s0] sm:$0xff]  ;;  %v16_v3 = vld [vmem:[%s149_s0 + $0x8] sm:$0xff]  ;;  %54 = vmatpush.bf16.msra.mxu0 %v91_v0  ;;  %92 = vmatpush.bf16.msra.mxu1 %v91_v0  ;;  %v18_v5 = vld [vmem:[%s149_s0 + $0x18] sm:$0xff] }
   0x3   :  { %v19_v6 = vpack.c.bf16 %v16_v3, %v15_v2  ;;  %v20_v7 = vpack.c.bf16 %v18_v5, %v17_v4  ;;  %v94_v8 = vld [vmem:[%s150_s2] ss:$0 sm:$0xff] }
   0x6   :  { %55 = vmatpush.bf16.msra.mxu0 %v90_v1  ;;  %93 = vmatpush.bf16.msra.mxu1 %v90_v1 }
   0x9   :  { %88 = vmatmul.msk.bf16.vlgmr.msra.gmra.mxu0 %vm41_vm0, %v19_v6  ;;  %89 = vmatmul.msk.bf16.vlgmr.msra.gmra.mxu1 %vm41_vm0, %v20_v7 }
  0x86   :  { %v57_v9 = vpop.f32.mrf.mxu0  ;;  %v62_v10 = vpop.f32.mrf.mxu1 }
  0x87   :  { %v58_v11 = vadd.f32 %v94_v8, %v57_v9  ;;  %v63_v12 = vadd.f32 %v94_v8, %v62_v10 }
  0x89   :  { %v67_v13 = vpack.c.bf16 %v58_v11, %v58_v11  ;;  %v69_v14 = vpack.c.bf16 %v63_v12, %v63_v12 }
  0x8b   :  { %72 = vst.msk [vmem:[%s151_s3] sm:$0xf] %vm71_vm1, %v67_v13 }
  0x8c   :  { %74 = vst.msk [vmem:[%s151_s3 + $0x8] sm:$0xf] %vm71_vm1, %v69_v14 }
  0x8e   :  { %v59_v15 = vpop.f32.mrf.mxu0  ;;  %v64_v16 = vpop.f32.mrf.mxu1 }
  0x8f   :  { %v60_v17 = vadd.f32 %v94_v8, %v59_v15  ;;  %v65_v18 = vadd.f32 %v94_v8, %v64_v16 }
  0x91   :  { %v68_v19 = vpack.c.bf16 %v60_v17, %v60_v17  ;;  %v70_v20 = vpack.c.bf16 %v65_v18, %v65_v18 }
  0x93   :  { %73 = vst.msk [vmem:[%s151_s3 + $0x4] sm:$0xf] %vm71_vm1, %v68_v19 }
  0x94   :  { %75 = vst.msk [vmem:[%s151_s3 + $0xc] sm:$0xf] %vm71_vm1, %v70_v20 }

// kernel: dilated_transformer_decoder_layer.19
= control target key start
LH: loop header
LB: loop body
LE: loop exit
PB: predicated region body
PF: predicated region fallthrough
CT: control target
= control target key end

     0   :  { %vm32_vm0 = vcmask 261120   ;;  %v244_v10 = vmov 32.0   ;;  %s359_s0 = inlined_call_operand.vmem [shape: bf16[32,32], index: 0, kind: input, shape index: {}]   ;;  %s360_s1 = inlined_call_operand.vmem [shape: f32[1,32], index: 1, kind: input, shape index: {}]   ;;  %s361_s2 = inlined_call_operand.vmem [shape: f32[1,32], index: 2, kind: input, shape index: {}]   ;;  %s362_s4 = inlined_call_operand.vmem [shape: f32[1,32], index: 4, kind: input, shape index: {}]   ;;  %s363_s3 = inlined_call_operand.vmem [shape: bf16[32,32], index: 3, kind: input, shape index: {}]   ;;  %s364_s5 = inlined_call_operand.vmem [shape: f32[32,32], index: 5, kind: input, shape index: {}, may-alias: {5,6}]   ;;  %s365_s6 = inlined_call_operand.vmem [shape: f32[32,32], index: 6, kind: output, shape index: {}, may-alias: {5,6}]  }
   0x1   :  { %v227_v0 = vld [vmem:[%s359_s0 + $0x8] sm:$0xff]   ;;  %v220_v1 = vld [vmem:[%s359_s0] sm:$0xff]   ;;  %234 = vrcp.f32 %v244_v10 }
   0x2   :  { %v225_v2 = vunpack.c.l.bf16 %v227_v0  ;;  %v221_v3 = vunpack.c.l.bf16 %v220_v1  ;;  %v226_v6 = vunpack.c.h.bf16 %v227_v0  ;;  %v222_v7 = vunpack.c.h.bf16 %v220_v1  ;;  %v218_v37 = vld [vmem:[%s363_s3 + $0x8] sm:$0xff]  ;;  %v217_v42 = vld [vmem:[%s363_s3] sm:$0xff] }
   0x3   :  { %178 = vmatpush.bf16.msra.mxu0 %v218_v37  ;;  %228 = vmatpush.bf16.msra.mxu1 %v218_v37 }
   0x4   :  { %v39_v4 = vsel %vm32_vm0, %v225_v2, 0.0  ;;  %v33_v5 = vsel %vm32_vm0, %v221_v3, 0.0  ;;  %v42_v8 = vsel %vm32_vm0, %v226_v6, 0.0  ;;  %v36_v9 = vsel %vm32_vm0, %v222_v7, 0.0 }
   0x5   :  { %40 = vadd.xlane.f32.xlu1 %v39_v4  ;;  %34 = vadd.xlane.f32.xlu0 %v33_v5 }
   0x7   :  { %v235_v11 = vpop.eup %234  ;;  %179 = vmatpush.bf16.msra.mxu0 %v217_v42  ;;  %229 = vmatpush.bf16.msra.mxu1 %v217_v42 }
   0x8   :  { %v46_v12 = vmul.f32 32.0, %v235_v11  ;;  %vm50_vm1 = vweird.f32 %v235_v11 }
   0xa   :  { %v47_v13 = vsub.f32 1.0, %v46_v12  ;;  %v231_v12 = vld [vmem:[%s360_s1] ss:$0 sm:$0xff] }
   0xc   :  { %v48_v14 = vmul.f32 %v235_v11, %v47_v13 }
   0xd   :  { %43 = vadd.xlane.f32.xlu1 %v42_v8  ;;  %37 = vadd.xlane.f32.xlu0 %v36_v9 }
   0xe   :  { %v49_v15 = vadd.f32 %v235_v11, %v48_v14 }
  0x10   :  { %v51_v16 = vsel %vm50_vm1, %v235_v11, %v49_v15 }
  0x78   :  { %v41_v17 = vpop.xlane.xlu1 %40  ;;  %v35_v18 = vpop.xlane.xlu0 %34 }
  0x79   :  { %v54_v19 = vmul.f32 %v51_v16, %v41_v17  ;;  %v52_v20 = vmul.f32 %v51_v16, %v35_v18 }
  0x7b   :  { %v290_v21 = vsub.f32 %v225_v2, %v54_v19  ;;  %v292_v22 = vsub.f32 %v221_v3, %v52_v20  ;;  %v232_v19 = vld [vmem:[%s361_s2] ss:$0 sm:$0xff] }
  0x7d   :  { %v62_v23 = vmul.f32 %v290_v21, %v290_v21  ;;  %v60_v24 = vmul.f32 %v292_v22, %v292_v22 }
  0x7f   :  { %v70_v25 = vsel %vm32_vm0, %v62_v23, 0.0  ;;  %v64_v26 = vsel %vm32_vm0, %v60_v24, 0.0 }
  0x80   :  { %v44_v27 = vpop.xlane.xlu1 %43  ;;  %71 = vadd.xlane.f32.xlu0 %v70_v25  ;;  %65 = vadd.xlane.f32.xlu2 %v64_v26  ;;  %v38_v28 = vpop.xlane.xlu0 %37 }
  0x81   :  { %v55_v29 = vmul.f32 %v51_v16, %v44_v27  ;;  %v53_v30 = vmul.f32 %v51_v16, %v38_v28 }
  0x83   :  { %v300_v31 = vsub.f32 %v226_v6, %v55_v29  ;;  %v302_v32 = vsub.f32 %v222_v7, %v53_v30 }
  0x85   :  { %v63_v33 = vmul.f32 %v300_v31, %v300_v31  ;;  %v61_v34 = vmul.f32 %v302_v32, %v302_v32 }
  0x87   :  { %v73_v35 = vsel %vm32_vm0, %v63_v33, 0.0  ;;  %v67_v36 = vsel %vm32_vm0, %v61_v34, 0.0 }
  0x88   :  { %74 = vadd.xlane.f32.xlu1 %v73_v35  ;;  %68 = vadd.xlane.f32.xlu2 %v67_v36  ;;  %v191_v35 = vld [vmem:[%s364_s5] sm:$0xff] }
  0xf3   :  { %v66_v38 = vpop.xlane.xlu2 %65  ;;  %v72_v39 = vpop.xlane.xlu0 %71 }
  0xf4   :  { %v76_v40 = vmul.f32 %v66_v38, %v51_v16  ;;  %v78_v41 = vmul.f32 %v72_v39, %v51_v16 }
  0xf6   :  { %v80_v43 = vadd.f32 1e-05, %v76_v40  ;;  %v82_v44 = vadd.f32 1e-05, %v78_v41 }
  0xf8   :  { %236 = vrsqrt.f32 %v80_v43  ;;  %vm110_vm4 = vweird.f32 %v82_v44  ;;  %vm90_vm5 = vweird.f32 %v80_v43 }
  0xf9   :  { %238 = vrsqrt.f32 %v82_v44 }
  0xfb   :  { %v75_v45 = vpop.xlane.xlu1 %74  ;;  %v69_v46 = vpop.xlane.xlu2 %68 }
  0xfc   :  { %v79_v47 = vmul.f32 %v75_v45, %v51_v16  ;;  %v77_v48 = vmul.f32 %v69_v46, %v51_v16 }
  0xfe   :  { %v237_v49 = vpop.eup %236  ;;  %v83_v50 = vadd.f32 1e-05, %v79_v47  ;;  %v81_v51 = vadd.f32 1e-05, %v77_v48 }
  0xff   :  { %v239_v52 = vpop.eup %238  ;;  %v85_v53 = vmul.f32 %v237_v49, %v80_v43  ;;  %vm91_vm3 = vweird.f32 %v237_v49 }
 0x100   :  { %v105_v54 = vmul.f32 %v239_v52, %v82_v44  ;;  %240 = vrsqrt.f32 %v83_v50  ;;  %vm111_vm2 = vweird.f32 %v239_v52  ;;  %vm92_vm7 = vmor %vm90_vm5, %vm91_vm3  ;;  %vm120_vm10 = vweird.f32 %v83_v50 }
 0x101   :  { %v86_v55 = vmul.f32 %v237_v49, %v85_v53  ;;  %242 = vrsqrt.f32 %v81_v51  ;;  %vm112_vm6 = vmor %vm110_vm4, %vm111_vm2  ;;  %vm100_vm12 = vweird.f32 %v81_v51 }
 0x102   :  { %v106_v56 = vmul.f32 %v239_v52, %v105_v54 }
 0x103   :  { %v87_v57 = vmul.f32 0.5, %v86_v55 }
 0x104   :  { %v107_v58 = vmul.f32 0.5, %v106_v56 }
 0x105   :  { %v88_v59 = vsub.f32 1.5, %v87_v57 }
 0x106   :  { %v241_v60 = vpop.eup %240  ;;  %v108_v61 = vsub.f32 1.5, %v107_v58 }
 0x107   :  { %v243_v62 = vpop.eup %242  ;;  %v115_v63 = vmul.f32 %v241_v60, %v83_v50  ;;  %v89_v0 = vmul.f32 %v237_v49, %v88_v59  ;;  %vm121_vm8 = vweird.f32 %v241_v60 }
 0x108   :  { %v109_v1 = vmul.f32 %v239_v52, %v108_v61  ;;  %v95_v2 = vmul.f32 %v243_v62, %v81_v51  ;;  %vm101_vm9 = vweird.f32 %v243_v62  ;;  %vm122_vm11 = vmor %vm120_vm10, %vm121_vm8 }
 0x109   :  { %v116_v3 = vmul.f32 %v241_v60, %v115_v63  ;;  %v93_v7 = vsel %vm92_vm7, %v237_v49, %v89_v0  ;;  %vm102_vm13 = vmor %vm100_vm12, %vm101_vm9 }
 0x10a   :  { %v96_v4 = vmul.f32 %v243_v62, %v95_v2  ;;  %v113_v5 = vsel %vm112_vm6, %v239_v52, %v109_v1  ;;  %v124_v13 = vmul.f32 %v93_v7, %v292_v22 }
 0x10b   :  { %v117_v6 = vmul.f32 0.5, %v116_v3  ;;  %v126_v10 = vmul.f32 %v113_v5, %v290_v21 }
 0x10c   :  { %v97_v8 = vmul.f32 0.5, %v96_v4  ;;  %v132_v23 = vmul.f32 %v231_v12, %v124_v13 }
 0x10d   :  { %v118_v9 = vsub.f32 1.5, %v117_v6  ;;  %v134_v20 = vmul.f32 %v231_v12, %v126_v10 }
 0x10e   :  { %v98_v11 = vsub.f32 1.5, %v97_v8  ;;  %v140_v27 = vadd.f32 %v232_v19, %v132_v23 }
 0x10f   :  { %v119_v14 = vmul.f32 %v241_v60, %v118_v9  ;;  %v142_v25 = vadd.f32 %v232_v19, %v134_v20 }
 0x110   :  { %v99_v15 = vmul.f32 %v243_v62, %v98_v11 }
 0x111   :  { %v123_v16 = vsel %vm122_vm11, %v241_v60, %v119_v14 }
 0x112   :  { %v127_v17 = vmul.f32 %v123_v16, %v300_v31  ;;  %v103_v18 = vsel %vm102_vm13, %v243_v62, %v99_v15  ;;  %v233_v31 = vld [vmem:[%s362_s4] ss:$0 sm:$0xff] }
 0x113   :  { %v125_v21 = vmul.f32 %v103_v18, %v302_v32  ;;  %v193_v32 = vld [vmem:[%s364_s5 + $0x10] sm:$0xff] }
 0x114   :  { %v135_v24 = vmul.f32 %v231_v12, %v127_v17 }
 0x115   :  { %v133_v22 = vmul.f32 %v231_v12, %v125_v21 }
 0x116   :  { %v143_v26 = vadd.f32 %v232_v19, %v135_v24 }
 0x117   :  { %v141_v28 = vadd.f32 %v232_v19, %v133_v22 }
 0x118   :  { %v145_v29 = vpack.c.bf16 %v143_v26, %v142_v25 }
 0x119   :  { %v144_v30 = vpack.c.bf16 %v141_v28, %v140_v27 }
 0x11a   :  { %216 = vmatmul.msk.bf16.vlgmr.msra.gmra.mxu1 %vm32_vm0, %v145_v29 }
 0x11b   :  { %215 = vmatmul.msk.bf16.vlgmr.msra.gmra.mxu0 %vm32_vm0, %v144_v30 }
 0x197   :  { %v186_v33 = vpop.f32.mrf.mxu1 }
 0x198   :  { %v181_v34 = vpop.f32.mrf.mxu0  ;;  %v187_v36 = vadd.f32 %v233_v31, %v186_v33 }
 0x199   :  { %v182_v37 = vadd.f32 %v233_v31, %v181_v34 }
 0x19a   :  { %v197_v38 = vadd.f32 %v193_v32, %v187_v36 }
 0x19b   :  { %v195_v39 = vadd.f32 %v191_v35, %v182_v37 }
 0x19c   :  { %201 = vst.msk [vmem:[%s365_s6 + $0x10] sm:$0xff] %vm32_vm0, %v197_v38 }
 0x19d   :  { %199 = vst.msk [vmem:[%s365_s6] sm:$0xff] %vm32_vm0, %v195_v39 }
 0x19f   :  { %v188_v40 = vpop.f32.mrf.mxu1 }
 0x1a0   :  { %v183_v42 = vpop.f32.mrf.mxu0  ;;  %v189_v44 = vadd.f32 %v233_v31, %v188_v40 }
 0x1a1   :  { %v184_v45 = vadd.f32 %v233_v31, %v183_v42 }
 0x1a4   :  { %v194_v41 = vld [vmem:[%s364_s5 + $0x18] sm:$0xff]  ;;  %v192_v43 = vld [vmem:[%s364_s5 + $0x8] sm:$0xff] }
 0x1a5   :  { %v198_v46 = vadd.f32 %v194_v41, %v189_v44  ;;  %v196_v47 = vadd.f32 %v192_v43, %v184_v45 }
 0x1a7   :  { %202 = vst.msk [vmem:[%s365_s6 + $0x18] sm:$0xff] %vm32_vm0, %v198_v46 }
 0x1a8   :  { %200 = vst.msk [vmem:[%s365_s6 + $0x8] sm:$0xff] %vm32_vm0, %v196_v47 }

// kernel: dilated_transformer_decoder_layer.20
= control target key start
LH: loop header
LB: loop body
LE: loop exit
PB: predicated region body
PF: predicated region fallthrough
CT: control target
= control target key end

     0   :  { %vm25_vm0 = vcmask 261120   ;;  %v229_v8 = vmov 32.0   ;;  %vm192_vm14 = vcmask 519168   ;;  %s329_s0 = inlined_call_operand.vmem [shape: f32[32,32], index: 0, kind: input, shape index: {}]   ;;  %s330_s1 = inlined_call_operand.vmem [shape: f32[1,32], index: 1, kind: input, shape index: {}]   ;;  %s331_s2 = inlined_call_operand.vmem [shape: f32[1,32], index: 2, kind: input, shape index: {}]   ;;  %s332_s4 = inlined_call_operand.vmem [shape: f32[1,64], index: 4, kind: input, shape index: {}]   ;;  %s333_s3 = inlined_call_operand.vmem [shape: bf16[32,64], index: 3, kind: input, shape index: {}]   ;;  %s334_s5 = inlined_call_operand.vmem [shape: bf16[32,64], index: 5, kind: output, shape index: {}]  }
   0x1   :  { %v23_v0 = vld [vmem:[%s329_s0 + $0x10] sm:$0xff]  ;;  %v21_v1 = vld [vmem:[%s329_s0] sm:$0xff]  ;;  %v24_v4 = vld [vmem:[%s329_s0 + $0x18] sm:$0xff]  ;;  %219 = vrcp.f32 %v229_v8 }
   0x2   :  { %v32_v2 = vsel %vm25_vm0, %v23_v0, 0.0  ;;  %v26_v3 = vsel %vm25_vm0, %v21_v1, 0.0  ;;  %v22_v5 = vld [vmem:[%s329_s0 + $0x8] sm:$0xff]  ;;  %v35_v6 = vsel %vm25_vm0, %v24_v4, 0.0  ;;  %v211_v40 = vld [vmem:[%s333_s3] sm:$0xff] }
   0x3   :  { %33 = vadd.xlane.f32.xlu1 %v32_v2  ;;  %27 = vadd.xlane.f32.xlu0 %v26_v3  ;;  %v29_v7 = vsel %vm25_vm0, %v22_v5, 0.0  ;;  %v212_v35 = vld [vmem:[%s333_s3 + $0x8] sm:$0xff] }
   0x4   :  { %171 = vmatpush.bf16.msra.mxu0 %v212_v35  ;;  %213 = vmatpush.bf16.msra.mxu1 %v212_v35 }
   0x7   :  { %v220_v9 = vpop.eup %219 }
   0x8   :  { %v39_v10 = vmul.f32 32.0, %v220_v9  ;;  %vm43_vm1 = vweird.f32 %v220_v9  ;;  %172 = vmatpush.bf16.msra.mxu0 %v211_v40  ;;  %214 = vmatpush.bf16.msra.mxu1 %v211_v40 }
   0xa   :  { %v40_v11 = vsub.f32 1.0, %v39_v10  ;;  %v216_v10 = vld [vmem:[%s330_s1] ss:$0 sm:$0xff] }
   0xb   :  { %36 = vadd.xlane.f32.xlu1 %v35_v6  ;;  %30 = vadd.xlane.f32.xlu0 %v29_v7 }
   0xc   :  { %v41_v12 = vmul.f32 %v220_v9, %v40_v11 }
   0xe   :  { %v42_v13 = vadd.f32 %v220_v9, %v41_v12 }
  0x10   :  { %v44_v14 = vsel %vm43_vm1, %v220_v9, %v42_v13 }
  0x76   :  { %v34_v15 = vpop.xlane.xlu1 %33  ;;  %v28_v16 = vpop.xlane.xlu0 %27 }
  0x77   :  { %v47_v17 = vmul.f32 %v44_v14, %v34_v15  ;;  %v45_v18 = vmul.f32 %v44_v14, %v28_v16 }
  0x79   :  { %v276_v19 = vsub.f32 %v23_v0, %v47_v17  ;;  %v278_v20 = vsub.f32 %v21_v1, %v45_v18  ;;  %v217_v17 = vld [vmem:[%s331_s2] ss:$0 sm:$0xff] }
  0x7b   :  { %v55_v21 = vmul.f32 %v276_v19, %v276_v19  ;;  %v53_v22 = vmul.f32 %v278_v20, %v278_v20 }
  0x7d   :  { %v63_v23 = vsel %vm25_vm0, %v55_v21, 0.0  ;;  %v57_v24 = vsel %vm25_vm0, %v53_v22, 0.0 }
  0x7e   :  { %v37_v25 = vpop.xlane.xlu1 %36  ;;  %64 = vadd.xlane.f32.xlu0 %v63_v23  ;;  %58 = vadd.xlane.f32.xlu2 %v57_v24  ;;  %v31_v26 = vpop.xlane.xlu0 %30 }
  0x7f   :  { %v48_v27 = vmul.f32 %v44_v14, %v37_v25  ;;  %v46_v28 = vmul.f32 %v44_v14, %v31_v26 }
  0x81   :  { %v286_v29 = vsub.f32 %v24_v4, %v48_v27  ;;  %v288_v30 = vsub.f32 %v22_v5, %v46_v28 }
  0x83   :  { %v56_v31 = vmul.f32 %v286_v29, %v286_v29  ;;  %v54_v32 = vmul.f32 %v288_v30, %v288_v30 }
  0x85   :  { %v66_v33 = vsel %vm25_vm0, %v56_v31, 0.0  ;;  %v60_v34 = vsel %vm25_vm0, %v54_v32, 0.0 }
  0x86   :  { %67 = vadd.xlane.f32.xlu1 %v66_v33  ;;  %61 = vadd.xlane.f32.xlu2 %v60_v34 }
  0xf1   :  { %v59_v36 = vpop.xlane.xlu2 %58  ;;  %v65_v37 = vpop.xlane.xlu0 %64 }
  0xf2   :  { %v69_v38 = vmul.f32 %v59_v36, %v44_v14  ;;  %v71_v39 = vmul.f32 %v65_v37, %v44_v14 }
  0xf4   :  { %v73_v41 = vadd.f32 1e-05, %v69_v38  ;;  %v75_v42 = vadd.f32 1e-05, %v71_v39 }
  0xf6   :  { %221 = vrsqrt.f32 %v73_v41  ;;  %vm103_vm4 = vweird.f32 %v75_v42  ;;  %vm83_vm5 = vweird.f32 %v73_v41 }
  0xf7   :  { %223 = vrsqrt.f32 %v75_v42 }
  0xf9   :  { %v68_v43 = vpop.xlane.xlu1 %67  ;;  %v62_v44 = vpop.xlane.xlu2 %61 }
  0xfa   :  { %v72_v45 = vmul.f32 %v68_v43, %v44_v14  ;;  %v70_v46 = vmul.f32 %v62_v44, %v44_v14 }
  0xfc   :  { %v222_v47 = vpop.eup %221  ;;  %v76_v48 = vadd.f32 1e-05, %v72_v45  ;;  %v74_v49 = vadd.f32 1e-05, %v70_v46 }
  0xfd   :  { %v224_v50 = vpop.eup %223  ;;  %v78_v51 = vmul.f32 %v222_v47, %v73_v41  ;;  %vm84_vm3 = vweird.f32 %v222_v47 }
  0xfe   :  { %v98_v52 = vmul.f32 %v224_v50, %v75_v42  ;;  %225 = vrsqrt.f32 %v76_v48  ;;  %vm104_vm2 = vweird.f32 %v224_v50  ;;  %vm85_vm7 = vmor %vm83_vm5, %vm84_vm3  ;;  %vm113_vm10 = vweird.f32 %v76_v48 }
  0xff   :  { %v79_v53 = vmul.f32 %v222_v47, %v78_v51  ;;  %227 = vrsqrt.f32 %v74_v49  ;;  %vm105_vm6 = vmor %vm103_vm4, %vm104_vm2  ;;  %vm93_vm12 = vweird.f32 %v74_v49 }
 0x100   :  { %v99_v54 = vmul.f32 %v224_v50, %v98_v52 }
 0x101   :  { %v80_v55 = vmul.f32 0.5, %v79_v53 }
 0x102   :  { %v100_v56 = vmul.f32 0.5, %v99_v54 }
 0x103   :  { %v81_v57 = vsub.f32 1.5, %v80_v55 }
 0x104   :  { %v226_v58 = vpop.eup %225  ;;  %v101_v59 = vsub.f32 1.5, %v100_v56 }
 0x105   :  { %v228_v60 = vpop.eup %227  ;;  %v108_v61 = vmul.f32 %v226_v58, %v76_v48  ;;  %v82_v62 = vmul.f32 %v222_v47, %v81_v57  ;;  %vm114_vm8 = vweird.f32 %v226_v58 }
 0x106   :  { %v102_v63 = vmul.f32 %v224_v50, %v101_v59  ;;  %v88_v0 = vmul.f32 %v228_v60, %v74_v49  ;;  %vm94_vm9 = vweird.f32 %v228_v60  ;;  %vm115_vm11 = vmor %vm113_vm10, %vm114_vm8 }
 0x107   :  { %v109_v1 = vmul.f32 %v226_v58, %v108_v61  ;;  %v86_v5 = vsel %vm85_vm7, %v222_v47, %v82_v62  ;;  %vm95_vm13 = vmor %vm93_vm12, %vm94_vm9 }
 0x108   :  { %v89_v2 = vmul.f32 %v228_v60, %v88_v0  ;;  %v106_v3 = vsel %vm105_vm6, %v224_v50, %v102_v63  ;;  %v117_v11 = vmul.f32 %v86_v5, %v278_v20 }
 0x109   :  { %v110_v4 = vmul.f32 0.5, %v109_v1  ;;  %v119_v8 = vmul.f32 %v106_v3, %v276_v19 }
 0x10a   :  { %v90_v6 = vmul.f32 0.5, %v89_v2  ;;  %v125_v21 = vmul.f32 %v216_v10, %v117_v11 }
 0x10b   :  { %v111_v7 = vsub.f32 1.5, %v110_v4  ;;  %v127_v18 = vmul.f32 %v216_v10, %v119_v8 }
 0x10c   :  { %v91_v9 = vsub.f32 1.5, %v90_v6  ;;  %v133_v25 = vadd.f32 %v217_v17, %v125_v21 }
 0x10d   :  { %v112_v12 = vmul.f32 %v226_v58, %v111_v7  ;;  %v135_v23 = vadd.f32 %v217_v17, %v127_v18 }
 0x10e   :  { %v92_v13 = vmul.f32 %v228_v60, %v91_v9 }
 0x10f   :  { %v116_v14 = vsel %vm115_vm11, %v226_v58, %v112_v12 }
 0x110   :  { %v120_v15 = vmul.f32 %v116_v14, %v286_v29  ;;  %v96_v16 = vsel %vm95_vm13, %v228_v60, %v92_v13  ;;  %v218_v29 = vld [vmem:[%s332_s4] ss:$0 sm:$0xff] }
 0x111   :  { %v118_v19 = vmul.f32 %v96_v16, %v288_v30 }
 0x112   :  { %v128_v22 = vmul.f32 %v216_v10, %v120_v15 }
 0x113   :  { %v126_v20 = vmul.f32 %v216_v10, %v118_v19 }
 0x114   :  { %v136_v24 = vadd.f32 %v217_v17, %v128_v22 }
 0x115   :  { %v134_v26 = vadd.f32 %v217_v17, %v126_v20 }
 0x116   :  { %v138_v27 = vpack.c.bf16 %v136_v24, %v135_v23 }
 0x117   :  { %v137_v28 = vpack.c.bf16 %v134_v26, %v133_v25 }
 0x118   :  { %210 = vmatmul.msk.bf16.vlgmr.msra.gmra.mxu1 %vm25_vm0, %v138_v27 }
 0x119   :  { %209 = vmatmul.msk.bf16.vlgmr.msra.gmra.mxu0 %vm25_vm0, %v137_v28 }
 0x195   :  { %v179_v31 = vpop.f32.mrf.mxu1 }
 0x196   :  { %v174_v32 = vpop.f32.mrf.mxu0  ;;  %v180_v30 = vadd.f32 %v218_v29, %v179_v31 }
 0x197   :  { %v175_v33 = vadd.f32 %v218_v29, %v174_v32 }
 0x198   :  { %v186_v34 = vmax.f32 %v180_v30, 0.0 }
 0x199   :  { %v184_v35 = vmax.f32 %v175_v33, 0.0 }
 0x19a   :  { %v190_v36 = vpack.c.bf16 %v186_v34, %v186_v34 }
 0x19b   :  { %v188_v37 = vpack.c.bf16 %v184_v35, %v184_v35 }
 0x19c   :  { %195 = vst.msk [vmem:[%s334_s5 + $0x8] sm:$0xf] %vm192_vm14, %v190_v36 }
 0x19d   :  { %193 = vst.msk [vmem:[%s334_s5] sm:$0xf] %vm192_vm14, %v188_v37  ;;  %v181_v38 = vpop.f32.mrf.mxu1 }
 0x19e   :  { %v176_v39 = vpop.f32.mrf.mxu0  ;;  %v182_v40 = vadd.f32 %v218_v29, %v181_v38 }
 0x19f   :  { %v177_v41 = vadd.f32 %v218_v29, %v176_v39 }
 0x1a0   :  { %v187_v42 = vmax.f32 %v182_v40, 0.0 }
 0x1a1   :  { %v185_v43 = vmax.f32 %v177_v41, 0.0 }
 0x1a2   :  { %v191_v44 = vpack.c.bf16 %v187_v42, %v187_v42 }
 0x1a3   :  { %v189_v45 = vpack.c.bf16 %v185_v43, %v185_v43 }
 0x1a4   :  { %196 = vst.msk [vmem:[%s334_s5 + $0xc] sm:$0xf] %vm192_vm14, %v191_v44 }
 0x1a5   :  { %194 = vst.msk [vmem:[%s334_s5 + $0x4] sm:$0xf] %vm192_vm14, %v189_v45 }

// kernel: dilated_transformer_decoder_layer.21
= control target key start
LH: loop header
LB: loop body
LE: loop exit
PB: predicated region body
PF: predicated region fallthrough
CT: control target
= control target key end

     0   :  { %vm32_vm0 = vcmask 523264   ;;  %v273_v10 = vmov 64.0   ;;  %vm215_vm14 = vcmask 261120   ;;  %s390_s0 = inlined_call_operand.vmem [shape: bf16[32,64], index: 0, kind: input, shape index: {}]   ;;  %s391_s1 = inlined_call_operand.vmem [shape: f32[1,64], index: 1, kind: input, shape index: {}]   ;;  %s392_s2 = inlined_call_operand.vmem [shape: f32[1,64], index: 2, kind: input, shape index: {}]   ;;  %s393_s4 = inlined_call_operand.vmem [shape: f32[1,32], index: 4, kind: input, shape index: {}]   ;;  %s394_s3 = inlined_call_operand.vmem [shape: bf16[64,32], index: 3, kind: input, shape index: {}]   ;;  %s395_s5 = inlined_call_operand.vmem [shape: f32[32,32], index: 5, kind: input, shape index: {}, may-alias: {5,6}]   ;;  %s396_s6 = inlined_call_operand.vmem [shape: f32[32,32], index: 6, kind: output, shape index: {}, may-alias: {5,6}]  }
   0x1   :  { %v254_v0 = vld [vmem:[%s390_s0 + $0x8] sm:$0xff]   ;;  %v247_v1 = vld [vmem:[%s390_s0] sm:$0xff]   ;;  %263 = vrcp.f32 %v273_v10  ;;  %v245_v37 = vld [vmem:[%s394_s3 + $0x18] sm:$0xff] }
   0x2   :  { %v252_v2 = vunpack.c.l.bf16 %v254_v0  ;;  %v248_v3 = vunpack.c.l.bf16 %v247_v1  ;;  %v253_v6 = vunpack.c.h.bf16 %v254_v0  ;;  %v249_v7 = vunpack.c.h.bf16 %v247_v1  ;;  %192 = vmatpush.bf16.msra.mxu0 %v245_v37  ;;  %255 = vmatpush.bf16.msra.mxu1 %v245_v37  ;;  %v244_v38 = vld [vmem:[%s394_s3 + $0x10] sm:$0xff]  ;;  %v243_v39 = vld [vmem:[%s394_s3 + $0x8] sm:$0xff]  ;;  %v242_v44 = vld [vmem:[%s394_s3] sm:$0xff] }
   0x3   :  { %v207_v37 = vld [vmem:[%s395_s5] sm:$0xff] }
   0x4   :  { %v39_v4 = vsel %vm32_vm0, %v252_v2, 0.0  ;;  %v33_v5 = vsel %vm32_vm0, %v248_v3, 0.0  ;;  %v42_v8 = vsel %vm32_vm0, %v253_v6, 0.0  ;;  %v36_v9 = vsel %vm32_vm0, %v249_v7, 0.0 }
   0x5   :  { %40 = vadd.xlane.f32.xlu1 %v39_v4  ;;  %34 = vadd.xlane.f32.xlu0 %v33_v5 }
   0x6   :  { %193 = vmatpush.bf16.msra.mxu0 %v244_v38  ;;  %256 = vmatpush.bf16.msra.mxu1 %v244_v38 }
   0x7   :  { %v264_v11 = vpop.eup %263 }
   0x8   :  { %v46_v12 = vmul.f32 64.0, %v264_v11  ;;  %vm50_vm1 = vweird.f32 %v264_v11 }
   0xa   :  { %v47_v13 = vsub.f32 1.0, %v46_v12  ;;  %194 = vmatpush.bf16.msra.mxu0 %v243_v39  ;;  %257 = vmatpush.bf16.msra.mxu1 %v243_v39 }
   0xc   :  { %v48_v14 = vmul.f32 %v264_v11, %v47_v13 }
   0xd   :  { %43 = vadd.xlane.f32.xlu1 %v42_v8  ;;  %37 = vadd.xlane.f32.xlu0 %v36_v9 }
   0xe   :  { %v49_v15 = vadd.f32 %v264_v11, %v48_v14  ;;  %195 = vmatpush.bf16.msra.mxu0 %v242_v44  ;;  %258 = vmatpush.bf16.msra.mxu1 %v242_v44  ;;  %v260_v14 = vld [vmem:[%s391_s1] ss:$0 sm:$0xff] }
  0x10   :  { %v51_v16 = vsel %vm50_vm1, %v264_v11, %v49_v15 }
  0x78   :  { %v41_v17 = vpop.xlane.xlu1 %40  ;;  %v35_v18 = vpop.xlane.xlu0 %34 }
  0x79   :  { %v54_v19 = vmul.f32 %v51_v16, %v41_v17  ;;  %v52_v20 = vmul.f32 %v51_v16, %v35_v18 }
  0x7b   :  { %v319_v21 = vsub.f32 %v252_v2, %v54_v19  ;;  %v321_v22 = vsub.f32 %v248_v3, %v52_v20 }
  0x7d   :  { %v62_v23 = vmul.f32 %v319_v21, %v319_v21  ;;  %v60_v24 = vmul.f32 %v321_v22, %v321_v22 }
  0x7f   :  { %v70_v25 = vsel %vm32_vm0, %v62_v23, 0.0  ;;  %v64_v26 = vsel %vm32_vm0, %v60_v24, 0.0 }
  0x80   :  { %v44_v27 = vpop.xlane.xlu1 %43  ;;  %71 = vadd.xlane.f32.xlu0 %v70_v25  ;;  %65 = vadd.xlane.f32.xlu2 %v64_v26  ;;  %v38_v28 = vpop.xlane.xlu0 %37 }
  0x81   :  { %v55_v29 = vmul.f32 %v51_v16, %v44_v27  ;;  %v53_v30 = vmul.f32 %v51_v16, %v38_v28 }
  0x83   :  { %v329_v31 = vsub.f32 %v253_v6, %v55_v29  ;;  %v331_v32 = vsub.f32 %v249_v7, %v53_v30 }
  0x85   :  { %v63_v33 = vmul.f32 %v329_v31, %v329_v31  ;;  %v61_v34 = vmul.f32 %v331_v32, %v331_v32 }
  0x87   :  { %v73_v35 = vsel %vm32_vm0, %v63_v33, 0.0  ;;  %v67_v36 = vsel %vm32_vm0, %v61_v34, 0.0 }
  0x88   :  { %74 = vadd.xlane.f32.xlu1 %v73_v35  ;;  %68 = vadd.xlane.f32.xlu2 %v67_v36 }
  0xf3   :  { %v66_v40 = vpop.xlane.xlu2 %65  ;;  %v72_v41 = vpop.xlane.xlu0 %71 }
  0xf4   :  { %v76_v42 = vmul.f32 %v66_v40, %v51_v16  ;;  %v78_v43 = vmul.f32 %v72_v41, %v51_v16 }
  0xf6   :  { %v80_v45 = vadd.f32 1e-05, %v76_v42  ;;  %v82_v46 = vadd.f32 1e-05, %v78_v43 }
  0xf8   :  { %265 = vrsqrt.f32 %v80_v45  ;;  %vm110_vm4 = vweird.f32 %v82_v46  ;;  %vm90_vm5 = vweird.f32 %v80_v45 }
  0xf9   :  { %267 = vrsqrt.f32 %v82_v46 }
  0xfb   :  { %v75_v47 = vpop.xlane.xlu1 %74  ;;  %v69_v48 = vpop.xlane.xlu2 %68 }
  0xfc   :  { %v79_v49 = vmul.f32 %v75_v47, %v51_v16  ;;  %v77_v50 = vmul.f32 %v69_v48, %v51_v16 }
  0xfe   :  { %v266_v51 = vpop.eup %265  ;;  %v83_v52 = vadd.f32 1e-05, %v79_v49  ;;  %v81_v53 = vadd.f32 1e-05, %v77_v50 }
  0xff   :  { %v268_v54 = vpop.eup %267  ;;  %v85_v55 = vmul.f32 %v266_v51, %v80_v45  ;;  %vm91_vm3 = vweird.f32 %v266_v51 }
 0x100   :  { %v105_v56 = vmul.f32 %v268_v54, %v82_v46  ;;  %269 = vrsqrt.f32 %v83_v52  ;;  %vm111_vm2 = vweird.f32 %v268_v54  ;;  %vm92_vm7 = vmor %vm90_vm5, %vm91_vm3  ;;  %vm120_vm10 = vweird.f32 %v83_v52 }
 0x101   :  { %v86_v57 = vmul.f32 %v266_v51, %v85_v55  ;;  %271 = vrsqrt.f32 %v81_v53  ;;  %vm112_vm6 = vmor %vm110_vm4, %vm111_vm2  ;;  %vm100_vm12 = vweird.f32 %v81_v53 }
 0x102   :  { %v106_v58 = vmul.f32 %v268_v54, %v105_v56 }
 0x103   :  { %v87_v59 = vmul.f32 0.5, %v86_v57 }
 0x104   :  { %v107_v60 = vmul.f32 0.5, %v106_v58 }
 0x105   :  { %v88_v61 = vsub.f32 1.5, %v87_v59 }
 0x106   :  { %v270_v62 = vpop.eup %269  ;;  %v108_v63 = vsub.f32 1.5, %v107_v60 }
 0x107   :  { %v272_v0 = vpop.eup %271  ;;  %v115_v1 = vmul.f32 %v270_v62, %v83_v52  ;;  %v89_v2 = vmul.f32 %v266_v51, %v88_v61  ;;  %vm121_vm8 = vweird.f32 %v270_v62 }
 0x108   :  { %v109_v3 = vmul.f32 %v268_v54, %v108_v63  ;;  %v95_v4 = vmul.f32 %v272_v0, %v81_v53  ;;  %vm101_vm9 = vweird.f32 %v272_v0  ;;  %vm122_vm11 = vmor %vm120_vm10, %vm121_vm8 }
 0x109   :  { %v116_v5 = vmul.f32 %v270_v62, %v115_v1  ;;  %v93_v9 = vsel %vm92_vm7, %v266_v51, %v89_v2  ;;  %vm102_vm13 = vmor %vm100_vm12, %vm101_vm9 }
 0x10a   :  { %v96_v6 = vmul.f32 %v272_v0, %v95_v4  ;;  %v113_v7 = vsel %vm112_vm6, %v268_v54, %v109_v3  ;;  %v124_v15 = vmul.f32 %v93_v9, %v321_v22 }
 0x10b   :  { %v117_v8 = vmul.f32 0.5, %v116_v5  ;;  %v126_v12 = vmul.f32 %v113_v7, %v319_v21  ;;  %v261_v21 = vld [vmem:[%s392_s2] ss:$0 sm:$0xff] }
 0x10c   :  { %v97_v10 = vmul.f32 0.5, %v96_v6  ;;  %v132_v25 = vmul.f32 %v260_v14, %v124_v15 }
 0x10d   :  { %v118_v11 = vsub.f32 1.5, %v117_v8  ;;  %v134_v23 = vmul.f32 %v260_v14, %v126_v12 }
 0x10e   :  { %v98_v13 = vsub.f32 1.5, %v97_v10  ;;  %v140_v29 = vadd.f32 %v261_v21, %v132_v25 }
 0x10f   :  { %v119_v16 = vmul.f32 %v270_v62, %v118_v11  ;;  %v142_v27 = vadd.f32 %v261_v21, %v134_v23 }
 0x110   :  { %v99_v17 = vmul.f32 %v272_v0, %v98_v13 }
 0x111   :  { %v123_v18 = vsel %vm122_vm11, %v270_v62, %v119_v16 }
 0x112   :  { %v127_v19 = vmul.f32 %v123_v18, %v329_v31  ;;  %v103_v20 = vsel %vm102_vm13, %v272_v0, %v99_v17  ;;  %v262_v31 = vld [vmem:[%s393_s4] ss:$0 sm:$0xff] }
 0x113   :  { %v125_v24 = vmul.f32 %v103_v20, %v331_v32  ;;  %v209_v32 = vld [vmem:[%s395_s5 + $0x10] sm:$0xff] }
 0x114   :  { %v135_v26 = vmul.f32 %v260_v14, %v127_v19 }
 0x115   :  { %v133_v22 = vmul.f32 %v260_v14, %v125_v24 }
 0x116   :  { %v143_v28 = vadd.f32 %v261_v21, %v135_v26 }
 0x117   :  { %v141_v30 = vadd.f32 %v261_v21, %v133_v22 }
 0x118   :  { %v145_v33 = vpack.c.bf16 %v143_v28, %v142_v27 }
 0x119   :  { %v144_v34 = vpack.c.bf16 %v141_v30, %v140_v29 }
 0x11a   :  { %241 = vmatmul.msk.bf16.vlgmr.msra.gmra.mxu1 %vm32_vm0, %v145_v33 }
 0x11b   :  { %240 = vmatmul.msk.bf16.vlgmr.msra.gmra.mxu0 %vm32_vm0, %v144_v34 }
 0x197   :  { %v202_v35 = vpop.f32.mrf.mxu1 }
 0x198   :  { %v197_v36 = vpop.f32.mrf.mxu0  ;;  %v203_v38 = vadd.f32 %v262_v31, %v202_v35 }
 0x199   :  { %v198_v39 = vadd.f32 %v262_v31, %v197_v36 }
 0x19a   :  { %v213_v40 = vadd.f32 %v209_v32, %v203_v38 }
 0x19b   :  { %v211_v41 = vadd.f32 %v207_v37, %v198_v39 }
 0x19c   :  { %218 = vst.msk [vmem:[%s396_s6 + $0x10] sm:$0xff] %vm215_vm14, %v213_v40 }
 0x19d   :  { %216 = vst.msk [vmem:[%s396_s6] sm:$0xff] %vm215_vm14, %v211_v41 }
 0x19f   :  { %v204_v42 = vpop.f32.mrf.mxu1 }
 0x1a0   :  { %v199_v44 = vpop.f32.mrf.mxu0  ;;  %v205_v46 = vadd.f32 %v262_v31, %v204_v42 }
 0x1a1   :  { %v200_v47 = vadd.f32 %v262_v31, %v199_v44 }
 0x1a4   :  { %v210_v43 = vld [vmem:[%s395_s5 + $0x18] sm:$0xff]  ;;  %v208_v45 = vld [vmem:[%s395_s5 + $0x8] sm:$0xff] }
 0x1a5   :  { %v214_v48 = vadd.f32 %v210_v43, %v205_v46  ;;  %v212_v49 = vadd.f32 %v208_v45, %v200_v47 }
 0x1a7   :  { %219 = vst.msk [vmem:[%s396_s6 + $0x18] sm:$0xff] %vm215_vm14, %v214_v48 }
 0x1a8   :  { %217 = vst.msk [vmem:[%s396_s6 + $0x8] sm:$0xff] %vm215_vm14, %v212_v49 }

</bundles_post_ra>
